<compile_context>
chip_gen: v6e
topology: v6e:2x2x1
jax: 0.10.0
libtpu: 0.0.40
codegen_flags: <defaults>
</compile_context>

<pallas_src>
import functools
import math

import jax
import jax.numpy as jnp
from jax import lax
from jax.experimental import pallas as pl
from jax.experimental.pallas import tpu as pltpu

EXPANSION = 4
BN_EPS = 1e-5


# --------------------------------------------------------------------------
# Pallas kernel: one (batch-element, output-row-block) tile of the bottleneck
# --------------------------------------------------------------------------
def _make_block_kernel(mode, stride, W, Wo, TRH, TIH, C1, C2, C4):
    """mode: 'fused'    -> stride==1, projection shortcut (conv1 + shortcut share one matmul)
             'proj'     -> stride!=1, projection shortcut
             'identity' -> stride==1, C1 == C4 (identity shortcut)."""
    f32 = jnp.float32
    bf16 = jnp.bfloat16

    def kernel(*refs):
        if mode == "fused":
            (x_ref, wf_ref, b1_ref, bs_ref, w2_ref, b2_ref, w3_ref, b3_ref,
             o_ref, h1p_ref, col_ref, sc_ref) = refs
        elif mode == "proj":
            (x_ref, w1_ref, b1_ref, ws_ref, bs_ref, w2_ref, b2_ref, w3_ref, b3_ref,
             o_ref, h1p_ref, col_ref, sc_ref) = refs
        else:  # identity
            (x_ref, w1_ref, b1_ref, w2_ref, b2_ref, w3_ref, b3_ref,
             o_ref, h1p_ref, col_ref, sc_ref) = refs

        j = pl.program_id(1)
        nrb = pl.num_programs(1)
        r0 = pl.multiple_of(j * TIH, TIH)          # first "main" input row of this block

        # conv1 weight view (C1, C2): used by non-fused modes and the halo rows.
        if mode == "fused":
            w1_mm = wf_ref[:, C4:]                 # bf16, vreg-aligned split (C4 first)
        else:
            w1_mm = w1_ref[...]

        # ---- conv1 (1x1) + bn1 + relu on this block's TIH input rows ------
        # In 'fused' mode the projection shortcut rides in the same matmul
        # (N = C4 + C2 -> one weight push, one pass over x).
        xm32 = x_ref[pl.ds(r0, TIH), :, :].reshape(TIH * W, C1)
        xm = xm32.astype(bf16)
        if mode == "fused":
            h1sc = jnp.dot(xm, wf_ref[...], preferred_element_type=f32)
            sc_ref[...] = h1sc[:, :C4] + bs_ref[...]
            h1 = jnp.maximum(h1sc[:, C4:] + b1_ref[...], 0.0)
        else:
            h1 = jnp.maximum(
                jnp.dot(xm, w1_mm, preferred_element_type=f32) + b1_ref[...], 0.0)
            if mode == "proj":
                # Strided 1x1 projection shortcut on the sub-sampled grid.
                # TODO(synk): the stride != 1 path is implemented but not
                # exercised by the __main__ check below; validate on hardware
                # before relying on it.
                xs = x_ref[pl.ds(r0, TRH, stride=stride),
                           pl.ds(0, Wo, stride=stride), :].reshape(TRH * Wo, C1)
                sc_ref[...] = (jnp.dot(xs.astype(bf16), ws_ref[...],
                                       preferred_element_type=f32) + bs_ref[...])
            else:  # identity shortcut (stride == 1, C1 == C4)
                sc_ref[...] = xm32

        # ---- padded conv1 activation for the 3x3 conv ----------------------
        # Only the 1-pixel halo is written; the interior is fully overwritten.
        h1p_ref[:, 0:1, :] = jnp.zeros((TIH + 2, 1, C2), f32)            # left halo
        h1p_ref[:, W + 1:W + 2, :] = jnp.zeros((TIH + 2, 1, C2), f32)    # right halo
        h1p_ref[1:TIH + 1, 1:W + 1, :] = h1.reshape(TIH, W, C2)          # interior

        @pl.when(j == 0)
        def _top_halo_zero():
            h1p_ref[0:1, 1:W + 1, :] = jnp.zeros((1, W, C2), f32)

        @pl.when(j > 0)
        def _top_halo_fill():      # recompute conv1 for the one halo row above
            xt = x_ref[pl.ds(r0 - 1, 1), :, :].reshape(W, C1).astype(bf16)
            ht = jnp.dot(xt, w1_mm, preferred_element_type=f32)
            h1p_ref[0:1, 1:W + 1, :] = jnp.maximum(ht + b1_ref[...], 0.0).reshape(1, W, C2)

        @pl.when(j == nrb - 1)
        def _bot_halo_zero():
            h1p_ref[TIH + 1:TIH + 2, 1:W + 1, :] = jnp.zeros((1, W, C2), f32)

        @pl.when(j < nrb - 1)
        def _bot_halo_fill():      # recompute conv1 for the one halo row below
            xb = x_ref[pl.ds(r0 + TIH, 1), :, :].reshape(W, C1).astype(bf16)
            hb = jnp.dot(xb, w1_mm, preferred_element_type=f32)
            h1p_ref[TIH + 1:TIH + 2, 1:W + 1, :] = jnp.maximum(
                hb + b1_ref[...], 0.0).reshape(1, W, C2)

        # ---- conv2 (3x3, stride, pad=1) + bn2 + relu ------------------------
        # Build an im2col slab in VMEM and do ONE K = 9*C2 matmul (accumulation
        # happens inside the MXU instead of 9 small dots + VPU adds).
        for dy in range(3):
            for dx in range(3):
                t = dy * 3 + dx
                if stride == 1:
                    patch = h1p_ref[dy:dy + TRH, dx:dx + Wo, :]
                else:
                    patch = h1p_ref[pl.ds(dy, TRH, stride=stride),
                                    pl.ds(dx, Wo, stride=stride), :]
                col_ref[:, t * C2:(t + 1) * C2] = patch.reshape(TRH * Wo, C2)

        h2 = jnp.dot(col_ref[...].astype(bf16), w2_ref[...],
                     preferred_element_type=f32)
        h2 = jnp.maximum(h2 + b2_ref[...], 0.0)                  # (TRH*Wo, C2) f32

        # ---- conv3 (1x1) + bn3 + shortcut + relu ----------------------------
        out = jnp.dot(h2.astype(bf16), w3_ref[...], preferred_element_type=f32)
        out = out + b3_ref[...] + sc_ref[...]
        # lane-dense store: last dim C4 (=128 in the demo) -> unmasked vst
        o_ref[...] = jnp.maximum(out, 0.0).reshape(TRH, Wo, C4)

    return kernel


# --------------------------------------------------------------------------
# Host-side wrapper
# --------------------------------------------------------------------------
def _fold_bn_into_conv(w, gamma, beta, mean, var, eps=BN_EPS):
    """Fold eval-mode BatchNorm into a bias-free conv: returns (scaled W, bias)."""
    s = gamma / jnp.sqrt(var + eps)
    return w * s[:, None, None, None], beta - mean * s


def _pick_row_block(Ho):
    """Largest divisor of Ho that is <= min(8, Ho//2) -> >=2 grid steps per image."""
    cap = max(1, min(8, Ho // 2))
    for d in range(cap, 0, -1):
        if Ho % d == 0:
            return d
    return 1


def resnet_block_forward(params, x, *, stride=1):
    """Inference forward of ResNetblock on NCHW float32 input."""
    B, C1, H, W = x.shape
    C2 = params["conv1_w"].shape[0]
    C4 = EXPANSION * C2
    has_sc_conv = (stride != 1) or (C1 != C4)
    if stride != 1:
        assert H % stride == 0 and W % stride == 0, "stride>1 path assumes even H, W"
    Ho = (H - 1) // stride + 1
    Wo = (W - 1) // stride + 1

    TRH = _pick_row_block(Ho)          # output rows per grid step
    TIH = TRH * stride                 # input rows per grid step (excl. 1-row halo)
    NRB = Ho // TRH

    # Fold eval-mode BatchNorms into the conv weights (param-sized work only).
    # TODO(synk): training-mode BatchNorm (batch statistics) is not implemented.
    w1, b1 = _fold_bn_into_conv(params["conv1_w"], params["bn1_g"], params["bn1_b"],
                                params["bn1_m"], params["bn1_v"])
    w2, b2 = _fold_bn_into_conv(params["conv2_w"], params["bn2_g"], params["bn2_b"],
                                params["bn2_m"], params["bn2_v"])
    w3, b3 = _fold_bn_into_conv(params["conv3_w"], params["bn3_g"], params["bn3_b"],
                                params["bn3_m"], params["bn3_v"])

    bf = jnp.bfloat16
    w1m = jnp.transpose(w1.reshape(C2, C1), (1, 0))               # (C1, C2)
    w2m = jnp.transpose(w2, (2, 3, 1, 0)).reshape(9 * C2, C2)     # (9*C2, C2), tap-major
    w3m = jnp.transpose(w3.reshape(C4, C2), (1, 0))               # (C2, C4)

    x_nhwc = jnp.transpose(x, (0, 2, 3, 1))                       # channels-last

    def const_spec(shape):                                        # grid-invariant operand
        return pl.BlockSpec(shape, lambda b, j: (0,) * len(shape))
    x_spec = pl.BlockSpec((None, H, W, C1), lambda b, j: (b, 0, 0, 0))

    if has_sc_conv:
        ws, bs = _fold_bn_into_conv(params["sc_w"], params["bns_g"], params["bns_b"],
                                    params["bns_m"], params["bns_v"])
        wsm = jnp.transpose(ws.reshape(C4, C1), (1, 0))           # (C1, C4)

    if has_sc_conv and stride == 1:
        mode = "fused"
        # shortcut columns first -> the in-kernel split lands on a vreg boundary
        wf = jnp.concatenate([wsm, w1m], axis=1)                  # (C1, C4 + C2)
        args = [x_nhwc, wf.astype(bf), b1.reshape(1, C2), bs.reshape(1, C4),
                w2m.astype(bf), b2.reshape(1, C2), w3m.astype(bf), b3.reshape(1, C4)]
        in_specs = [x_spec, const_spec((C1, C4 + C2)), const_spec((1, C2)),
                    const_spec((1, C4)), const_spec((9 * C2, C2)), const_spec((1, C2)),
                    const_spec((C2, C4)), const_spec((1, C4))]
    elif has_sc_conv:
        mode = "proj"
        args = [x_nhwc, w1m.astype(bf), b1.reshape(1, C2),
                wsm.astype(bf), bs.reshape(1, C4),
                w2m.astype(bf), b2.reshape(1, C2), w3m.astype(bf), b3.reshape(1, C4)]
        in_specs = [x_spec, const_spec((C1, C2)), const_spec((1, C2)),
                    const_spec((C1, C4)), const_spec((1, C4)),
                    const_spec((9 * C2, C2)), const_spec((1, C2)),
                    const_spec((C2, C4)), const_spec((1, C4))]
    else:
        mode = "identity"
        args = [x_nhwc, w1m.astype(bf), b1.reshape(1, C2),
                w2m.astype(bf), b2.reshape(1, C2), w3m.astype(bf), b3.reshape(1, C4)]
        in_specs = [x_spec, const_spec((C1, C2)), const_spec((1, C2)),
                    const_spec((9 * C2, C2)), const_spec((1, C2)),
                    const_spec((C2, C4)), const_spec((1, C4))]

    kernel = _make_block_kernel(mode, stride, W, Wo, TRH, TIH, C1, C2, C4)

    out_nhwc = pl.pallas_call(
        kernel,
        out_shape=jax.ShapeDtypeStruct((B, Ho, Wo, C4), jnp.float32),
        grid=(B, NRB),
        in_specs=in_specs,
        out_specs=pl.BlockSpec((None, TRH, Wo, C4), lambda b, j: (b, j, 0, 0)),
        scratch_shapes=[
            pltpu.VMEM((TIH + 2, W + 2, C2), jnp.float32),   # padded conv1 activation
            pltpu.VMEM((TRH * Wo, 9 * C2), jnp.float32),     # im2col slab
            pltpu.VMEM((TRH * Wo, C4), jnp.float32),         # shortcut rows
        ],
        compiler_params=pltpu.CompilerParams(
            dimension_semantics=("parallel", "parallel"),
            vmem_limit_bytes=32 * 1024 * 1024),
    )(*args)

    # TODO(synk): in a full ResNet keep activations NHWC (and optionally bf16)
    # between blocks so these layout transposes only happen at the network edges.
    # TODO(synk): mark the grid-invariant weight specs pipeline_mode=pl.Buffered(1)
    # (single-buffered) once validated on the target JAX version, to save VMEM on v7x.
    return jnp.transpose(out_nhwc, (0, 3, 1, 2))                  # back to NCHW


# --------------------------------------------------------------------------
# Pure-JAX reference (lax.conv) for correctness checking
# --------------------------------------------------------------------------
def _bn_eval(z, g, b, m, v, eps=BN_EPS):
    s = (g / jnp.sqrt(v + eps))[None, :, None, None]
    return (z - m[None, :, None, None]) * s + b[None, :, None, None]


def _conv_nchw(x, w, stride, padding):
    return lax.conv_general_dilated(
        x, w, window_strides=(stride, stride),
        padding=((padding, padding), (padding, padding)),
        dimension_numbers=("NCHW", "OIHW", "NCHW"))


def resnet_block_reference(params, x, *, stride=1):
    C1 = x.shape[1]
    C4 = EXPANSION * params["conv1_w"].shape[0]
    out = jax.nn.relu(_bn_eval(_conv_nchw(x, params["conv1_w"], 1, 0),
                               params["bn1_g"], params["bn1_b"],
                               params["bn1_m"], params["bn1_v"]))
    out = jax.nn.relu(_bn_eval(_conv_nchw(out, params["conv2_w"], stride, 1),
                               params["bn2_g"], params["bn2_b"],
                               params["bn2_m"], params["bn2_v"]))
    out = _bn_eval(_conv_nchw(out, params["conv3_w"], 1, 0),
                   params["bn3_g"], params["bn3_b"],
                   params["bn3_m"], params["bn3_v"])
    if stride != 1 or C1 != C4:
        sc = _bn_eval(_conv_nchw(x, params["sc_w"], stride, 0),
                      params["bns_g"], params["bns_b"],
                      params["bns_m"], params["bns_v"])
    else:
        sc = x
    return jax.nn.relu(out + sc)


# --------------------------------------------------------------------------
# Deterministic parameter init
# --------------------------------------------------------------------------
def init_params(key, c1, c2, stride=1):
    c4 = EXPANSION * c2
    has_sc_conv = (stride != 1) or (c1 != c4)
    ks = list(jax.random.split(key, 20))

    def conv_w(k, o, i, kh, kw):
        bnd = 1.0 / math.sqrt(i * kh * kw)
        return jax.random.uniform(k, (o, i, kh, kw), jnp.float32, -bnd, bnd)

    def bn(kg, kb, km, kv, n):
        return (jax.random.uniform(kg, (n,), jnp.float32, 0.5, 1.5),
                jax.random.uniform(kb, (n,), jnp.float32, -0.1, 0.1),
                jax.random.uniform(km, (n,), jnp.float32, -0.2, 0.2),
                jax.random.uniform(kv, (n,), jnp.float32, 0.5, 1.5))

    p = {}
    p["conv1_w"] = conv_w(ks[0], c2, c1, 1, 1)
    p["bn1_g"], p["bn1_b"], p["bn1_m"], p["bn1_v"] = bn(ks[1], ks[2], ks[3], ks[4], c2)
    p["conv2_w"] = conv_w(ks[5], c2, c2, 3, 3)
    p["bn2_g"], p["bn2_b"], p["bn2_m"], p["bn2_v"] = bn(ks[6], ks[7], ks[8], ks[9], c2)
    p["conv3_w"] = conv_w(ks[10], c4, c2, 1, 1)
    p["bn3_g"], p["bn3_b"], p["bn3_m"], p["bn3_v"] = bn(ks[11], ks[12], ks[13], ks[14], c4)
    if has_sc_conv:
        p["sc_w"] = conv_w(ks[15], c4, c1, 1, 1)
        p["bns_g"], p["bns_b"], p["bns_m"], p["bns_v"] = bn(ks[16], ks[17], ks[18], ks[19], c4)
    return p


# --------------------------------------------------------------------------
if __name__ == "__main__":
    key = jax.random.PRNGKey(0)

    # (name, B, c1, c2, stride, H=W) — exercises the fused projection-shortcut
    # path (4*c2 = 128 lane-dense output) and the identity-shortcut path.
    configs = [
        ("projection shortcut, stride 1", 2, 64, 32, 1, 16),
        ("identity shortcut,   stride 1", 2, 128, 32, 1, 16),
    ]

    for name, B, c1, c2, stride, H in configs:
        kp, kx, key = jax.random.split(key, 3)
        params = init_params(kp, c1, c2, stride)
        x = jax.random.normal(kx, (B, c1, H, H), jnp.float32)

        fwd = jax.jit(functools.partial(resnet_block_forward, stride=stride))
        out = fwd(params, x)
        jax.block_until_ready(out)

        ref = resnet_block_reference(params, x, stride=stride)
        err = float(jnp.max(jnp.abs(out - ref)))
        # bf16 MXU operands vs. the all-f32 reference -> relative tolerance.
        tol = 4e-2 * float(jnp.max(jnp.abs(ref))) + 1e-3

        Hout = (H - 1) // stride + 1
        assert out.shape == (B, EXPANSION * c2, Hout, Hout), (name, out.shape)
        assert bool(jnp.all(jnp.isfinite(out))), name
        assert err < tol, f"{name}: max abs error {err} vs tol {tol}"

    print("KERNEL_OK")
</pallas_src>

<mosaic_0001>
module attributes {stable_mosaic.version = 11 : i64} {
  func.func @kernel(%arg0: i32, %arg1: i32, %arg2: memref<1x16x16x64xf32, #tpu.memory_space<vmem>>, %arg3: memref<64x160xbf16, #tpu.memory_space<vmem>>, %arg4: memref<1x32xf32, #tpu.memory_space<vmem>>, %arg5: memref<1x128xf32, #tpu.memory_space<vmem>>, %arg6: memref<288x32xbf16, #tpu.memory_space<vmem>>, %arg7: memref<1x32xf32, #tpu.memory_space<vmem>>, %arg8: memref<32x128xbf16, #tpu.memory_space<vmem>>, %arg9: memref<1x128xf32, #tpu.memory_space<vmem>>, %arg10: memref<1x8x16x128xf32, #tpu.memory_space<vmem>>, %arg11: memref<10x18x32xf32, #tpu.memory_space<vmem>>, %arg12: memref<128x288xf32, #tpu.memory_space<vmem>>, %arg13: memref<128x128xf32, #tpu.memory_space<vmem>>) attributes {dimension_semantics = [#tpu.dimension_semantics<parallel>, #tpu.dimension_semantics<parallel>], iteration_bounds = array<i64: 2, 2>, scalar_prefetch = 0 : i64, scratch_operands = 3 : i64, tpu.core_type = #tpu.core_type<tc>, window_params = [{transform_indices = @transform_0, window_bounds = array<i64: 1, 16, 16, 64>}, {pipeline_mode = #tpu.pipeline_mode<synchronous>, transform_indices = @transform_1, window_bounds = array<i64: 64, 160>}, {pipeline_mode = #tpu.pipeline_mode<synchronous>, transform_indices = @transform_2, window_bounds = array<i64: 1, 32>}, {pipeline_mode = #tpu.pipeline_mode<synchronous>, transform_indices = @transform_3, window_bounds = array<i64: 1, 128>}, {pipeline_mode = #tpu.pipeline_mode<synchronous>, transform_indices = @transform_4, window_bounds = array<i64: 288, 32>}, {pipeline_mode = #tpu.pipeline_mode<synchronous>, transform_indices = @transform_5, window_bounds = array<i64: 1, 32>}, {pipeline_mode = #tpu.pipeline_mode<synchronous>, transform_indices = @transform_6, window_bounds = array<i64: 32, 128>}, {pipeline_mode = #tpu.pipeline_mode<synchronous>, transform_indices = @transform_7, window_bounds = array<i64: 1, 128>}, {transform_indices = @transform_8, window_bounds = array<i64: 1, 8, 16, 128>}]} {
    %c8_i32 = arith.constant 8 : i32
    %0 = arith.muli %arg1, %c8_i32 : i32
    %1 = tpu.assume_multiple %0, 8 : i32
    %c0 = arith.constant 0 : index
    %c128 = arith.constant 128 : index
    %2 = vector.load %arg3[%c0, %c128] : memref<64x160xbf16, #tpu.memory_space<vmem>>, vector<64x32xbf16>
    %c0_0 = arith.constant 0 : index
    %3 = arith.index_cast %1 : i32 to index
    %c0_1 = arith.constant 0 : index
    %c0_2 = arith.constant 0 : index
    %4 = vector.load %arg2[%c0_0, %3, %c0_1, %c0_2] : memref<1x16x16x64xf32, #tpu.memory_space<vmem>>, vector<1x8x16x64xf32>
    %5 = vector.shape_cast %4 : vector<1x8x16x64xf32> to vector<8x16x64xf32>
    %6 = vector.shape_cast %5 : vector<8x16x64xf32> to vector<128x64xf32>
    %7 = arith.truncf %6 : vector<128x64xf32> to vector<128x64xbf16>
    %c0_3 = arith.constant 0 : index
    %c0_4 = arith.constant 0 : index
    %8 = vector.load %arg3[%c0_3, %c0_4] : memref<64x160xbf16, #tpu.memory_space<vmem>>, vector<64x160xbf16>
    %cst = arith.constant dense<0.000000e+00> : vector<128x160xf32>
    %9 = tpu.matmul %7, %8, %cst {dimension_numbers = #tpu.dot_dimension_numbers<[1], [0], [0], [1], [0, 0, 1, 1], [], []>} : vector<128x64xbf16>, vector<64x160xbf16>, vector<128x160xf32> -> vector<128x160xf32>
    %10 = vector.extract_strided_slice %9 {offsets = [0, 0], sizes = [128, 128], strides = [1, 1]} : vector<128x160xf32> to vector<128x128xf32>
    %c0_5 = arith.constant 0 : index
    %c0_6 = arith.constant 0 : index
    %11 = vector.load %arg5[%c0_5, %c0_6] : memref<1x128xf32, #tpu.memory_space<vmem>>, vector<1x128xf32>
    %12 = vector.broadcast %11 : vector<1x128xf32> to vector<128x128xf32>
    %13 = arith.addf %10, %12 : vector<128x128xf32>
    %c0_7 = arith.constant 0 : index
    %c0_8 = arith.constant 0 : index
    %14 = vector.load %arg13[%c0_7, %c0_8] : memref<128x128xf32, #tpu.memory_space<vmem>>, vector<128x128xf32>
    tpu.vector_store %arg13[%c0_7, %c0_8], %13 {strides = array<i32>} : memref<128x128xf32, #tpu.memory_space<vmem>>, vector<128x128xf32>,
    %15 = vector.extract_strided_slice %9 {offsets = [0, 128], sizes = [128, 32], strides = [1, 1]} : vector<128x160xf32> to vector<128x32xf32>
    %c0_9 = arith.constant 0 : index
    %c0_10 = arith.constant 0 : index
    %16 = vector.load %arg4[%c0_9, %c0_10] : memref<1x32xf32, #tpu.memory_space<vmem>>, vector<1x32xf32>
    %17 = vector.broadcast %16 : vector<1x32xf32> to vector<128x32xf32>
    %18 = arith.addf %15, %17 : vector<128x32xf32>
    %cst_11 = arith.constant 0.000000e+00 : f32
    %19 = vector.broadcast %cst_11 : f32 to vector<128x32xf32>
    %20 = arith.maximumf %18, %19 : vector<128x32xf32>
    %cst_12 = arith.constant 0.000000e+00 : f32
    %21 = vector.broadcast %cst_12 : f32 to vector<10x1x32xf32>
    %c0_13 = arith.constant 0 : index
    %c0_14 = arith.constant 0 : index
    %c0_15 = arith.constant 0 : index
    %22 = vector.load %arg11[%c0_13, %c0_14, %c0_15] : memref<10x18x32xf32, #tpu.memory_space<vmem>>, vector<10x1x32xf32>
    tpu.vector_store %arg11[%c0_13, %c0_14, %c0_15], %21 {strides = array<i32>} : memref<10x18x32xf32, #tpu.memory_space<vmem>>, vector<10x1x32xf32>,
    %cst_16 = arith.constant 0.000000e+00 : f32
    %23 = vector.broadcast %cst_16 : f32 to vector<10x1x32xf32>
    %c0_17 = arith.constant 0 : index
    %c17 = arith.constant 17 : index
    %c0_18 = arith.constant 0 : index
    %24 = vector.load %arg11[%c0_17, %c17, %c0_18] : memref<10x18x32xf32, #tpu.memory_space<vmem>>, vector<10x1x32xf32>
    tpu.vector_store %arg11[%c0_17, %c17, %c0_18], %23 {strides = array<i32>} : memref<10x18x32xf32, #tpu.memory_space<vmem>>, vector<10x1x32xf32>,
    %25 = vector.shape_cast %20 : vector<128x32xf32> to vector<8x16x32xf32>
    %c1 = arith.constant 1 : index
    %c1_19 = arith.constant 1 : index
    %c0_20 = arith.constant 0 : index
    %26 = vector.load %arg11[%c1, %c1_19, %c0_20] : memref<10x18x32xf32, #tpu.memory_space<vmem>>, vector<8x16x32xf32>
    tpu.vector_store %arg11[%c1, %c1_19, %c0_20], %25 {strides = array<i32>} : memref<10x18x32xf32, #tpu.memory_space<vmem>>, vector<8x16x32xf32>,
    %c0_i32 = arith.constant 0 : i32
    %27 = arith.cmpi eq, %arg1, %c0_i32 : i32
    %28 = arith.extui %27 : i1 to i32
    %c0_i32_21 = arith.constant 0 : i32
    %29 = arith.cmpi ne, %28, %c0_i32_21 : i32
    scf.if %29 {
      %cst_84 = arith.constant 0.000000e+00 : f32
      %89 = vector.broadcast %cst_84 : f32 to vector<1x16x32xf32>
      %c0_85 = arith.constant 0 : index
      %c1_86 = arith.constant 1 : index
      %c0_87 = arith.constant 0 : index
      %90 = vector.load %arg11[%c0_85, %c1_86, %c0_87] : memref<10x18x32xf32, #tpu.memory_space<vmem>>, vector<1x16x32xf32>
      tpu.vector_store %arg11[%c0_85, %c1_86, %c0_87], %89 {strides = array<i32>} : memref<10x18x32xf32, #tpu.memory_space<vmem>>, vector<1x16x32xf32>,
    } else {
    }
    %c0_i32_22 = arith.constant 0 : i32
    %30 = arith.cmpi sgt, %arg1, %c0_i32_22 : i32
    %31 = arith.extui %30 : i1 to i32
    %c0_i32_23 = arith.constant 0 : i32
    %32 = arith.cmpi ne, %31, %c0_i32_23 : i32
    scf.if %32 {
      %c1_i32_84 = arith.constant 1 : i32
      %89 = arith.subi %1, %c1_i32_84 : i32
      %c0_85 = arith.constant 0 : index
      %90 = arith.index_cast %89 : i32 to index
      %c0_86 = arith.constant 0 : index
      %c0_87 = arith.constant 0 : index
      %91 = vector.load %arg2[%c0_85, %90, %c0_86, %c0_87] : memref<1x16x16x64xf32, #tpu.memory_space<vmem>>, vector<1x1x16x64xf32>
      %92 = vector.shape_cast %91 : vector<1x1x16x64xf32> to vector<1x16x64xf32>
      %93 = vector.shape_cast %92 : vector<1x16x64xf32> to vector<16x64xf32>
      %94 = arith.truncf %93 : vector<16x64xf32> to vector<16x64xbf16>
      %cst_88 = arith.constant dense<0.000000e+00> : vector<16x32xf32>
      %95 = tpu.matmul %94, %2, %cst_88 {dimension_numbers = #tpu.dot_dimension_numbers<[1], [0], [0], [1], [0, 0, 1, 1], [], []>} : vector<16x64xbf16>, vector<64x32xbf16>, vector<16x32xf32> -> vector<16x32xf32>
      %c0_89 = arith.constant 0 : index
      %c0_90 = arith.constant 0 : index
      %96 = vector.load %arg4[%c0_89, %c0_90] : memref<1x32xf32, #tpu.memory_space<vmem>>, vector<1x32xf32>
      %97 = vector.broadcast %96 : vector<1x32xf32> to vector<16x32xf32>
      %98 = arith.addf %95, %97 : vector<16x32xf32>
      %cst_91 = arith.constant 0.000000e+00 : f32
      %99 = vector.broadcast %cst_91 : f32 to vector<16x32xf32>
      %100 = arith.maximumf %98, %99 : vector<16x32xf32>
      %101 = vector.shape_cast %100 : vector<16x32xf32> to vector<1x16x32xf32>
      %c0_92 = arith.constant 0 : index
      %c1_93 = arith.constant 1 : index
      %c0_94 = arith.constant 0 : index
      %102 = vector.load %arg11[%c0_92, %c1_93, %c0_94] : memref<10x18x32xf32, #tpu.memory_space<vmem>>, vector<1x16x32xf32>
      tpu.vector_store %arg11[%c0_92, %c1_93, %c0_94], %101 {strides = array<i32>} : memref<10x18x32xf32, #tpu.memory_space<vmem>>, vector<1x16x32xf32>,
    } else {
    }
    %c1_i32 = arith.constant 1 : i32
    %33 = arith.cmpi eq, %arg1, %c1_i32 : i32
    %34 = arith.extui %33 : i1 to i32
    %c0_i32_24 = arith.constant 0 : i32
    %35 = arith.cmpi ne, %34, %c0_i32_24 : i32
    scf.if %35 {
      %cst_84 = arith.constant 0.000000e+00 : f32
      %89 = vector.broadcast %cst_84 : f32 to vector<1x16x32xf32>
      %c9 = arith.constant 9 : index
      %c1_85 = arith.constant 1 : index
      %c0_86 = arith.constant 0 : index
      %90 = vector.load %arg11[%c9, %c1_85, %c0_86] : memref<10x18x32xf32, #tpu.memory_space<vmem>>, vector<1x16x32xf32>
      tpu.vector_store %arg11[%c9, %c1_85, %c0_86], %89 {strides = array<i32>} : memref<10x18x32xf32, #tpu.memory_space<vmem>>, vector<1x16x32xf32>,
    } else {
    }
    %c1_i32_25 = arith.constant 1 : i32
    %36 = arith.cmpi slt, %arg1, %c1_i32_25 : i32
    %37 = arith.extui %36 : i1 to i32
    %c0_i32_26 = arith.constant 0 : i32
    %38 = arith.cmpi ne, %37, %c0_i32_26 : i32
    scf.if %38 {
      %c8_i32_84 = arith.constant 8 : i32
      %89 = arith.addi %1, %c8_i32_84 : i32
      %c0_85 = arith.constant 0 : index
      %90 = arith.index_cast %89 : i32 to index
      %c0_86 = arith.constant 0 : index
      %c0_87 = arith.constant 0 : index
      %91 = vector.load %arg2[%c0_85, %90, %c0_86, %c0_87] : memref<1x16x16x64xf32, #tpu.memory_space<vmem>>, vector<1x1x16x64xf32>
      %92 = vector.shape_cast %91 : vector<1x1x16x64xf32> to vector<1x16x64xf32>
      %93 = vector.shape_cast %92 : vector<1x16x64xf32> to vector<16x64xf32>
      %94 = arith.truncf %93 : vector<16x64xf32> to vector<16x64xbf16>
      %cst_88 = arith.constant dense<0.000000e+00> : vector<16x32xf32>
      %95 = tpu.matmul %94, %2, %cst_88 {dimension_numbers = #tpu.dot_dimension_numbers<[1], [0], [0], [1], [0, 0, 1, 1], [], []>} : vector<16x64xbf16>, vector<64x32xbf16>, vector<16x32xf32> -> vector<16x32xf32>
      %c0_89 = arith.constant 0 : index
      %c0_90 = arith.constant 0 : index
      %96 = vector.load %arg4[%c0_89, %c0_90] : memref<1x32xf32, #tpu.memory_space<vmem>>, vector<1x32xf32>
      %97 = vector.broadcast %96 : vector<1x32xf32> to vector<16x32xf32>
      %98 = arith.addf %95, %97 : vector<16x32xf32>
      %cst_91 = arith.constant 0.000000e+00 : f32
      %99 = vector.broadcast %cst_91 : f32 to vector<16x32xf32>
      %100 = arith.maximumf %98, %99 : vector<16x32xf32>
      %101 = vector.shape_cast %100 : vector<16x32xf32> to vector<1x16x32xf32>
      %c9 = arith.constant 9 : index
      %c1_92 = arith.constant 1 : index
      %c0_93 = arith.constant 0 : index
      %102 = vector.load %arg11[%c9, %c1_92, %c0_93] : memref<10x18x32xf32, #tpu.memory_space<vmem>>, vector<1x16x32xf32>
      tpu.vector_store %arg11[%c9, %c1_92, %c0_93], %101 {strides = array<i32>} : memref<10x18x32xf32, #tpu.memory_space<vmem>>, vector<1x16x32xf32>,
    } else {
    }
    %c0_27 = arith.constant 0 : index
    %c0_28 = arith.constant 0 : index
    %c0_29 = arith.constant 0 : index
    %39 = vector.load %arg11[%c0_27, %c0_28, %c0_29] : memref<10x18x32xf32, #tpu.memory_space<vmem>>, vector<8x16x32xf32>
    %40 = vector.shape_cast %39 : vector<8x16x32xf32> to vector<128x32xf32>
    %c0_30 = arith.constant 0 : index
    %c0_31 = arith.constant 0 : index
    %41 = vector.load %arg12[%c0_30, %c0_31] : memref<128x288xf32, #tpu.memory_space<vmem>>, vector<128x32xf32>
    tpu.vector_store %arg12[%c0_30, %c0_31], %40 {strides = array<i32>} : memref<128x288xf32, #tpu.memory_space<vmem>>, vector<128x32xf32>,
    %c0_32 = arith.constant 0 : index
    %c1_33 = arith.constant 1 : index
    %c0_34 = arith.constant 0 : index
    %42 = vector.load %arg11[%c0_32, %c1_33, %c0_34] : memref<10x18x32xf32, #tpu.memory_space<vmem>>, vector<8x16x32xf32>
    %43 = vector.shape_cast %42 : vector<8x16x32xf32> to vector<128x32xf32>
    %c0_35 = arith.constant 0 : index
    %c32 = arith.constant 32 : index
    %44 = vector.load %arg12[%c0_35, %c32] : memref<128x288xf32, #tpu.memory_space<vmem>>, vector<128x32xf32>
    tpu.vector_store %arg12[%c0_35, %c32], %43 {strides = array<i32>} : memref<128x288xf32, #tpu.memory_space<vmem>>, vector<128x32xf32>,
    %c0_36 = arith.constant 0 : index
    %c2 = arith.constant 2 : index
    %c0_37 = arith.constant 0 : index
    %45 = vector.load %arg11[%c0_36, %c2, %c0_37] : memref<10x18x32xf32, #tpu.memory_space<vmem>>, vector<8x16x32xf32>
    %46 = vector.shape_cast %45 : vector<8x16x32xf32> to vector<128x32xf32>
    %c0_38 = arith.constant 0 : index
    %c64 = arith.constant 64 : index
    %47 = vector.load %arg12[%c0_38, %c64] : memref<128x288xf32, #tpu.memory_space<vmem>>, vector<128x32xf32>
    tpu.vector_store %arg12[%c0_38, %c64], %46 {strides = array<i32>} : memref<128x288xf32, #tpu.memory_space<vmem>>, vector<128x32xf32>,
    %c1_39 = arith.constant 1 : index
    %c0_40 = arith.constant 0 : index
    %c0_41 = arith.constant 0 : index
    %48 = vector.load %arg11[%c1_39, %c0_40, %c0_41] : memref<10x18x32xf32, #tpu.memory_space<vmem>>, vector<8x16x32xf32>
    %49 = vector.shape_cast %48 : vector<8x16x32xf32> to vector<128x32xf32>
    %c0_42 = arith.constant 0 : index
    %c96 = arith.constant 96 : index
    %50 = vector.load %arg12[%c0_42, %c96] : memref<128x288xf32, #tpu.memory_space<vmem>>, vector<128x32xf32>
    tpu.vector_store %arg12[%c0_42, %c96], %49 {strides = array<i32>} : memref<128x288xf32, #tpu.memory_space<vmem>>, vector<128x32xf32>,
    %c1_43 = arith.constant 1 : index
    %c1_44 = arith.constant 1 : index
    %c0_45 = arith.constant 0 : index
    %51 = vector.load %arg11[%c1_43, %c1_44, %c0_45] : memref<10x18x32xf32, #tpu.memory_space<vmem>>, vector<8x16x32xf32>
    %52 = vector.shape_cast %51 : vector<8x16x32xf32> to vector<128x32xf32>
    %c0_46 = arith.constant 0 : index
    %c128_47 = arith.constant 128 : index
    %53 = vector.load %arg12[%c0_46, %c128_47] : memref<128x288xf32, #tpu.memory_space<vmem>>, vector<128x32xf32>
    tpu.vector_store %arg12[%c0_46, %c128_47], %52 {strides = array<i32>} : memref<128x288xf32, #tpu.memory_space<vmem>>, vector<128x32xf32>,
    %c1_48 = arith.constant 1 : index
    %c2_49 = arith.constant 2 : index
    %c0_50 = arith.constant 0 : index
    %54 = vector.load %arg11[%c1_48, %c2_49, %c0_50] : memref<10x18x32xf32, #tpu.memory_space<vmem>>, vector<8x16x32xf32>
    %55 = vector.shape_cast %54 : vector<8x16x32xf32> to vector<128x32xf32>
    %c0_51 = arith.constant 0 : index
    %c160 = arith.constant 160 : index
    %56 = vector.load %arg12[%c0_51, %c160] : memref<128x288xf32, #tpu.memory_space<vmem>>, vector<128x32xf32>
    tpu.vector_store %arg12[%c0_51, %c160], %55 {strides = array<i32>} : memref<128x288xf32, #tpu.memory_space<vmem>>, vector<128x32xf32>,
    %c2_52 = arith.constant 2 : index
    %c0_53 = arith.constant 0 : index
    %c0_54 = arith.constant 0 : index
    %57 = vector.load %arg11[%c2_52, %c0_53, %c0_54] : memref<10x18x32xf32, #tpu.memory_space<vmem>>, vector<8x16x32xf32>
    %58 = vector.shape_cast %57 : vector<8x16x32xf32> to vector<128x32xf32>
    %c0_55 = arith.constant 0 : index
    %c192 = arith.constant 192 : index
    %59 = vector.load %arg12[%c0_55, %c192] : memref<128x288xf32, #tpu.memory_space<vmem>>, vector<128x32xf32>
    tpu.vector_store %arg12[%c0_55, %c192], %58 {strides = array<i32>} : memref<128x288xf32, #tpu.memory_space<vmem>>, vector<128x32xf32>,
    %c2_56 = arith.constant 2 : index
    %c1_57 = arith.constant 1 : index
    %c0_58 = arith.constant 0 : index
    %60 = vector.load %arg11[%c2_56, %c1_57, %c0_58] : memref<10x18x32xf32, #tpu.memory_space<vmem>>, vector<8x16x32xf32>
    %61 = vector.shape_cast %60 : vector<8x16x32xf32> to vector<128x32xf32>
    %c0_59 = arith.constant 0 : index
    %c224 = arith.constant 224 : index
    %62 = vector.load %arg12[%c0_59, %c224] : memref<128x288xf32, #tpu.memory_space<vmem>>, vector<128x32xf32>
    tpu.vector_store %arg12[%c0_59, %c224], %61 {strides = array<i32>} : memref<128x288xf32, #tpu.memory_space<vmem>>, vector<128x32xf32>,
    %c2_60 = arith.constant 2 : index
    %c2_61 = arith.constant 2 : index
    %c0_62 = arith.constant 0 : index
    %63 = vector.load %arg11[%c2_60, %c2_61, %c0_62] : memref<10x18x32xf32, #tpu.memory_space<vmem>>, vector<8x16x32xf32>
    %64 = vector.shape_cast %63 : vector<8x16x32xf32> to vector<128x32xf32>
    %c0_63 = arith.constant 0 : index
    %c256 = arith.constant 256 : index
    %65 = vector.load %arg12[%c0_63, %c256] : memref<128x288xf32, #tpu.memory_space<vmem>>, vector<128x32xf32>
    tpu.vector_store %arg12[%c0_63, %c256], %64 {strides = array<i32>} : memref<128x288xf32, #tpu.memory_space<vmem>>, vector<128x32xf32>,
    %c0_64 = arith.constant 0 : index
    %c0_65 = arith.constant 0 : index
    %66 = vector.load %arg12[%c0_64, %c0_65] : memref<128x288xf32, #tpu.memory_space<vmem>>, vector<128x288xf32>
    %67 = arith.truncf %66 : vector<128x288xf32> to vector<128x288xbf16>
    %c0_66 = arith.constant 0 : index
    %c0_67 = arith.constant 0 : index
    %68 = vector.load %arg6[%c0_66, %c0_67] : memref<288x32xbf16, #tpu.memory_space<vmem>>, vector<288x32xbf16>
    %cst_68 = arith.constant dense<0.000000e+00> : vector<128x32xf32>
    %69 = tpu.matmul %67, %68, %cst_68 {dimension_numbers = #tpu.dot_dimension_numbers<[1], [0], [0], [1], [0, 0, 1, 1], [], []>} : vector<128x288xbf16>, vector<288x32xbf16>, vector<128x32xf32> -> vector<128x32xf32>
    %c0_69 = arith.constant 0 : index
    %c0_70 = arith.constant 0 : index
    %70 = vector.load %arg7[%c0_69, %c0_70] : memref<1x32xf32, #tpu.memory_space<vmem>>, vector<1x32xf32>
    %71 = vector.broadcast %70 : vector<1x32xf32> to vector<128x32xf32>
    %72 = arith.addf %69, %71 : vector<128x32xf32>
    %cst_71 = arith.constant 0.000000e+00 : f32
    %73 = vector.broadcast %cst_71 : f32 to vector<128x32xf32>
    %74 = arith.maximumf %72, %73 : vector<128x32xf32>
    %75 = arith.truncf %74 : vector<128x32xf32> to vector<128x32xbf16>
    %c0_72 = arith.constant 0 : index
    %c0_73 = arith.constant 0 : index
    %76 = vector.load %arg8[%c0_72, %c0_73] : memref<32x128xbf16, #tpu.memory_space<vmem>>, vector<32x128xbf16>
    %cst_74 = arith.constant dense<0.000000e+00> : vector<128x128xf32>
    %77 = tpu.matmul %75, %76, %cst_74 {dimension_numbers = #tpu.dot_dimension_numbers<[1], [0], [0], [1], [0, 0, 1, 1], [], []>} : vector<128x32xbf16>, vector<32x128xbf16>, vector<128x128xf32> -> vector<128x128xf32>
    %c0_75 = arith.constant 0 : index
    %c0_76 = arith.constant 0 : index
    %78 = vector.load %arg9[%c0_75, %c0_76] : memref<1x128xf32, #tpu.memory_space<vmem>>, vector<1x128xf32>
    %79 = vector.broadcast %78 : vector<1x128xf32> to vector<128x128xf32>
    %80 = arith.addf %77, %79 : vector<128x128xf32>
    %c0_77 = arith.constant 0 : index
    %c0_78 = arith.constant 0 : index
    %81 = vector.load %arg13[%c0_77, %c0_78] : memref<128x128xf32, #tpu.memory_space<vmem>>, vector<128x128xf32>
    %82 = arith.addf %80, %81 : vector<128x128xf32>
    %cst_79 = arith.constant 0.000000e+00 : f32
    %83 = vector.broadcast %cst_79 : f32 to vector<128x128xf32>
    %84 = arith.maximumf %82, %83 : vector<128x128xf32>
    %85 = vector.shape_cast %84 : vector<128x128xf32> to vector<8x16x128xf32>
    %c0_80 = arith.constant 0 : index
    %c0_81 = arith.constant 0 : index
    %c0_82 = arith.constant 0 : index
    %c0_83 = arith.constant 0 : index
    %86 = vector.load %arg10[%c0_80, %c0_81, %c0_82, %c0_83] : memref<1x8x16x128xf32, #tpu.memory_space<vmem>>, vector<1x8x16x128xf32>
    %87 = vector.shape_cast %86 : vector<1x8x16x128xf32> to vector<8x16x128xf32>
    %88 = vector.shape_cast %85 : vector<8x16x128xf32> to vector<1x8x16x128xf32>
    tpu.vector_store %arg10[%c0_80, %c0_81, %c0_82, %c0_83], %88 {strides = array<i32>} : memref<1x8x16x128xf32, #tpu.memory_space<vmem>>, vector<1x8x16x128xf32>,
    return
  }
  func.func @transform_0(%arg0: i32, %arg1: i32) -> (i32, i32, i32, i32) {
    %c0_i32 = arith.constant 0 : i32
    %c0_i32_0 = arith.constant 0 : i32
    %c0_i32_1 = arith.constant 0 : i32
    %c0_i32_2 = arith.constant 0 : i32
    return %arg0, %c0_i32, %c0_i32_0, %c0_i32_1 : i32, i32, i32, i32
  }
  func.func @transform_1(%arg0: i32, %arg1: i32) -> (i32, i32) {
    %c0_i32 = arith.constant 0 : i32
    %c0_i32_0 = arith.constant 0 : i32
    %c0_i32_1 = arith.constant 0 : i32
    return %c0_i32, %c0_i32_0 : i32, i32
  }
  func.func @transform_2(%arg0: i32, %arg1: i32) -> (i32, i32) {
    %c0_i32 = arith.constant 0 : i32
    %c0_i32_0 = arith.constant 0 : i32
    %c0_i32_1 = arith.constant 0 : i32
    return %c0_i32, %c0_i32_0 : i32, i32
  }
  func.func @transform_3(%arg0: i32, %arg1: i32) -> (i32, i32) {
    %c0_i32 = arith.constant 0 : i32
    %c0_i32_0 = arith.constant 0 : i32
    %c0_i32_1 = arith.constant 0 : i32
    return %c0_i32, %c0_i32_0 : i32, i32
  }
  func.func @transform_4(%arg0: i32, %arg1: i32) -> (i32, i32) {
    %c0_i32 = arith.constant 0 : i32
    %c0_i32_0 = arith.constant 0 : i32
    %c0_i32_1 = arith.constant 0 : i32
    return %c0_i32, %c0_i32_0 : i32, i32
  }
  func.func @transform_5(%arg0: i32, %arg1: i32) -> (i32, i32) {
    %c0_i32 = arith.constant 0 : i32
    %c0_i32_0 = arith.constant 0 : i32
    %c0_i32_1 = arith.constant 0 : i32
    return %c0_i32, %c0_i32_0 : i32, i32
  }
  func.func @transform_6(%arg0: i32, %arg1: i32) -> (i32, i32) {
    %c0_i32 = arith.constant 0 : i32
    %c0_i32_0 = arith.constant 0 : i32
    %c0_i32_1 = arith.constant 0 : i32
    return %c0_i32, %c0_i32_0 : i32, i32
  }
  func.func @transform_7(%arg0: i32, %arg1: i32) -> (i32, i32) {
    %c0_i32 = arith.constant 0 : i32
    %c0_i32_0 = arith.constant 0 : i32
    %c0_i32_1 = arith.constant 0 : i32
    return %c0_i32, %c0_i32_0 : i32, i32
  }
  func.func @transform_8(%arg0: i32, %arg1: i32) -> (i32, i32, i32, i32) {
    %c0_i32 = arith.constant 0 : i32
    %c0_i32_0 = arith.constant 0 : i32
    %c0_i32_1 = arith.constant 0 : i32
    return %arg0, %arg1, %c0_i32, %c0_i32_0 : i32, i32, i32, i32
  }
}

</mosaic_0001>

<bundles_post_ra>
// kernel: resnet_block_forward.1
= control target key start
LH: loop header
LB: loop body
LE: loop exit
PB: predicated region body
PF: predicated region fallthrough
CT: control target
= control target key end

     0   :  { %13 = vsyncpa [#allocation6], 0  ;;  %s3797_s0 = inlined_call_operand.vmem [shape: f32[2,16,16,64], index: 0, kind: input, shape index: {}]   ;;  %s3798_s1 = inlined_call_operand.vmem [shape: bf16[64,160], index: 1, kind: input, shape index: {}]   ;;  %s3799_s2 = inlined_call_operand.vmem [shape: f32[1,32], index: 2, kind: input, shape index: {}]   ;;  %s3800_s3 = inlined_call_operand.vmem [shape: f32[1,128], index: 3, kind: input, shape index: {}]   ;;  %s3801_s4 = inlined_call_operand.vmem [shape: bf16[288,32], index: 4, kind: input, shape index: {}]   ;;  %s3802_s5 = inlined_call_operand.vmem [shape: f32[1,32], index: 5, kind: input, shape index: {}]   ;;  %s3803_s6 = inlined_call_operand.vmem [shape: bf16[32,128], index: 6, kind: input, shape index: {}]   ;;  %s3804_s7 = inlined_call_operand.vmem [shape: f32[1,128], index: 7, kind: input, shape index: {}]   ;;  %s3805_s8 = inlined_call_operand.hbm [shape: f32[2,16,16,128], index: 8, kind: output, shape index: {}]  }
   0x1   :  { %15 = vsyncpa [#allocation6 + $0x1], 0  ;;  %s2834_s27 = smov 0   ;;  %s2836_s28 = smov 0  }
   0x2   :  { %s2838_s29 = smov 0   ;;  %s2840_s30 = smov 0  }
   0x3   :  { %s2842_s9 = smov 0   ;;  %s2844_s10 = smov 0  }
   0x4   :  { %s2846_s11 = smov 0   ;;  %s2848_s12 = smov 0  }
   0x5 LB: > { %3810 = sst [smem:[#allocation8_spill]] %s2769_s11  ;;  %s2300_s13 = sadd.s32 4294967295, %s2773_s12   ;;  %s2773_s12 = sphi %s2848_s12, %s21_s12   ;;  %s2769_s11 = sphi %s2846_s11, %s3819_s11   ;;  %s2765_s10 = sphi %s2844_s10, %s3824_s10   ;;  %s2761_s9 = sphi %s2842_s9, %s3817_s9   ;;  %s2757_s30 = sphi %s2840_s30, %s3823_s30   ;;  %s2753_s29 = sphi %s2838_s29, %s3822_s29   ;;  %s2749_s28 = sphi %s2836_s28, %s3821_s28   ;;  %s2745_s27 = sphi %s2834_s27, %s3820_s27  }
   0x6   : > { %s2301_s14 = sadd.s32 4294967294, %s2773_s12   ;;  %s30_s15 = sadd.s32 1, %s2765_s10 }
   0x7   : > { %p31_p0 = scmp.ge.s32.totalorder %s30_s15, 2  ;;  %s33_s16 = sadd.s32 1, %s2769_s11 }
   0x8   : > { %p225_p1 = scmp.ne.s32.totalorder %s2753_s29, %s2749_s28  ;;  %p226_p2 = scmp.eq.s32.totalorder %s2300_s13, 3 }
   0x9   : > { %s3826_s15 = smov (%p31_p0, %s30_s15), 0  ;;  %s3828_s16 = smov (!%p31_p0, %s33_s16), %s2769_s11 }
   0xa   : > { %3811 = sst [smem:[#allocation9_spill]] %s3826_s15  ;;  %s211_s17 = ssub.s32 %s2765_s10, %s3826_s15 }
   0xb   : > { %p2885_p3 = por %p226_p2, %p225_p1  ;;  %p35_p4 = scmp.ge.s32.totalorder %s3828_s16, 2 }
   0xc   : > { %p231_p5 = scmp.ne.s32.totalorder %s2749_s28, %s2745_s27  ;;  %p232_p6 = scmp.eq.s32.totalorder %s2301_s14, 3 }
   0xd   : > { %p2304_p7 = scmp.ge.s32.totalorder %s2773_s12, 1  ;;  %s3830_s16 = smov (%p35_p4, %s3828_s16), 0 }
   0xe   : > { %3813 = sst [smem:[#allocation10_spill]] %s3830_s16  ;;  %p2894_p8 = por %p232_p6, %p231_p5 }
   0xf   : > { %p279_p9 = scmp.lt.s32.totalorder %s2773_s12, 5  ;;  %s210_s20 = ssub.s32 %s2769_s11, %s3830_s16 }
  0x10   : > { %s215_s21 = sadd.s32 1, %s2753_s29  ;;  %s212_s22 = sor.u32 %s211_s17, %s210_s20 }
  0x11   : > { %p280_p10 = pnand %p2304_p7, %p279_p9  ;;  %p213_p11 = scmp.eq.s32.totalorder %s212_s22, 0 }
  0x12   : > { %s3807_s24 = sand.u32 (!%p280_p10), 1, %s2749_s28   ;;  %p313_p12 = scmp.lt.s32.totalorder (!%p280_p10), %s2761_s9, 1 }
  0x13   : > { %s2903_s23 = scalar_select %p213_p11, %s2753_s29, %s215_s21  }
  0x14   : > { %283 = sbr.rel (%p280_p10) target bundleno = 1479 (0x5c7), region = 52  ;;  %s2919_s17 = sshll.u32 (!%p280_p10), %s3807_s24, 7 }
  0x15   : > { %s2396_s15 = sshll.u32 (!%p280_p10), %s2757_s30, 7  ;;  %s3089_s20 = scalar_lea.vmem (!%p280_p10), [#allocation5], %s2919_s17 }
  0x16   : > { %p2328_p13 = scmp.ne.s32.totalorder (!%p280_p10), %s2757_s30, 0 }
  0x19   : > { %v2910_v0 = vld [vmem:[%s3798_s1 + $0x4] sm:$0xf]  ;;  %v2915_v1 = vld [vmem:[%s3798_s1 + $0xc] sm:$0xf]  ;;  %v2924_v2 = vld [vmem:[%s3798_s1 + $0x14] sm:$0xf] }
  0x1a   : > { %v2929_v3 = vld [vmem:[%s3798_s1 + $0x1c] sm:$0xf]  ;;  %v2934_v4 = vld [vmem:[%s3798_s1 + $0x24] sm:$0xf]  ;;  %v2939_v5 = vld [vmem:[%s3798_s1 + $0x2c] sm:$0xf] }
  0x1b   : > { %v2944_v6 = vld [vmem:[%s3798_s1 + $0x34] sm:$0xf]  ;;  %v2949_v7 = vld [vmem:[%s3798_s1 + $0x3c] sm:$0xf]  ;;  %v2651_v9 = vld [vmem:[%s3798_s1 + $0x30] ss:$8 sps:$4 sm:$0xff]  }
  0x1c   : > { %v2649_v8 = vld [vmem:[%s3798_s1 + $0x34] ss:$8 sps:$4 sm:$0xff]   ;;  %v2652_v10 = vld [vmem:[%s3798_s1 + $0x24] ss:$8 sps:$4 sm:$0xff]   ;;  %v2654_v11 = vld [vmem:[%s3798_s1 + $0x20] ss:$8 sps:$4 sm:$0xff]  }
  0x1d   : > { %436 = vmatprep.subr.bf16.mxu0 %v2649_v8  ;;  %2557 = vmatprep.subr.bf16.mxu1 %v2649_v8  ;;  %s314_s21 = scalar_select %p313_p12, %s2761_s9, 1  ;;  %v2655_v12 = vld [vmem:[%s3798_s1 + $0x14] ss:$8 sps:$4 sm:$0xff]   ;;  %v2775_v13 = vmov 0   ;;  %v2657_v14 = vld [vmem:[%s3798_s1 + $0x10] ss:$8 sps:$4 sm:$0xff]  }
  0x1e   : > { %437 = vmatpush1.bf16.msra.mxu0 %v2651_v9  ;;  %2561 = vmatpush1.bf16.msra.mxu1 %v2651_v9  ;;  %v2658_v15 = vld [vmem:[%s3798_s1 + $0x4] ss:$8 sps:$4 sm:$0xff]   ;;  %v2660_v16 = vld [vmem:[%s3798_s1] ss:$8 sps:$4 sm:$0xff]   ;;  %vm403_vm0 = vcmask 523264   ;;  %vm619_vm1 = vcmask 253952  }
  0x1f   : > { %438 = vmatprep.subr.bf16.mxu0 %v2652_v10  ;;  %2558 = vmatprep.subr.bf16.mxu1 %v2652_v10  ;;  %s2395_s26 = sshll.u32 %s314_s21, 8  ;;  %v2776_v41 = vmov 0.0   ;;  %v3033_v42 = vld [vmem:[%s3800_s3] ss:$0 sm:$0xff]  ;;  %vm641_vm2 = vcmask 261120  }
  0x20   : > { %460 = vmatprep.mubr.bf16.mxu0 %v2775_v13  ;;  %500 = vmatprep.mubr.bf16.mxu1 %v2775_v13  ;;  %s2972_s16 = scalar_lea.vmem %s3797_s0, %s2395_s26  ;;  %620 = vst.msk [vmem:[#allocation2] sm:$0x1] %vm619_vm1, %v2776_v41  ;;  %621 = vst.msk [vmem:[#allocation2 + $0x18] sm:$0x1] %vm619_vm1, %v2776_v41  ;;  %v3038_v45 = vld [vmem:[%s3799_s2] ss:$0 sm:$0xff] }
  0x21   : > { %s2978_s11 = scalar_lea.vmem %s2972_s16, %s2396_s15  ;;  %622 = vst.msk [vmem:[#allocation2 + $0x30] sm:$0x1] %vm619_vm1, %v2776_v41  ;;  %623 = vst.msk [vmem:[#allocation2 + $0x48] sm:$0x1] %vm619_vm1, %v2776_v41 }
  0x22   : > { %439 = vmatpush1.bf16.msra.mxu0 %v2654_v11  ;;  %2562 = vmatpush1.bf16.msra.mxu1 %v2654_v11  ;;  %v331_v17 = vld [vmem:[%s2978_s11] sm:$0xff]  ;;  %v332_v18 = vld [vmem:[%s2978_s11 + $0x8] sm:$0xff]  ;;  %v333_v23 = vld [vmem:[%s2978_s11 + $0x10] sm:$0xff]  ;;  %624 = vst.msk [vmem:[#allocation2 + $0x60] sm:$0x1] %vm619_vm1, %v2776_v41 }
  0x23   : > { %440 = vmatprep.subr.bf16.mxu0 %v2655_v12  ;;  %2559 = vmatprep.subr.bf16.mxu1 %v2655_v12  ;;  %v339_v19 = vld [vmem:[%s2978_s11 + $0x40] sm:$0xff]  ;;  %v340_v20 = vld [vmem:[%s2978_s11 + $0x48] sm:$0xff]  ;;  %v347_v21 = vpack.c.bf16 %v332_v18, %v331_v17  ;;  %v334_v24 = vld [vmem:[%s2978_s11 + $0x18] sm:$0xff]  ;;  %625 = vst.msk [vmem:[#allocation2 + $0x78] sm:$0x1] %vm619_vm1, %v2776_v41 }
  0x24   : > { %v351_v22 = vpack.c.bf16 %v340_v20, %v339_v19  ;;  %v341_v25 = vld [vmem:[%s2978_s11 + $0x50] sm:$0xff]  ;;  %v342_v26 = vld [vmem:[%s2978_s11 + $0x58] sm:$0xff]  ;;  %v348_v27 = vpack.c.bf16 %v334_v24, %v333_v23  ;;  %v335_v29 = vld [vmem:[%s2978_s11 + $0x20] sm:$0xff]  ;;  %626 = vst.msk [vmem:[#allocation2 + $0x90] sm:$0x1] %vm619_vm1, %v2776_v41 }
  0x25   : > { %v352_v28 = vpack.c.bf16 %v342_v26, %v341_v25  ;;  %v336_v30 = vld [vmem:[%s2978_s11 + $0x28] sm:$0xff]  ;;  %v343_v31 = vld [vmem:[%s2978_s11 + $0x60] sm:$0xff]  ;;  %v337_v35 = vld [vmem:[%s2978_s11 + $0x30] sm:$0xff]  ;;  %627 = vst.msk [vmem:[#allocation2 + $0xa8] sm:$0x1] %vm619_vm1, %v2776_v41 }
  0x26   : > { %441 = vmatpush1.bf16.msra.mxu0 %v2657_v14  ;;  %2563 = vmatpush1.bf16.msra.mxu1 %v2657_v14  ;;  %v344_v32 = vld [vmem:[%s2978_s11 + $0x68] sm:$0xff]  ;;  %v349_v33 = vpack.c.bf16 %v336_v30, %v335_v29  ;;  %v338_v36 = vld [vmem:[%s2978_s11 + $0x38] sm:$0xff]  ;;  %v345_v37 = vld [vmem:[%s2978_s11 + $0x70] sm:$0xff]  ;;  %628 = vst.msk [vmem:[#allocation2 + $0xc0] sm:$0x1] %vm619_vm1, %v2776_v41 }
  0x27   : > { %442 = vmatprep.subr.bf16.mxu0 %v2658_v15  ;;  %2560 = vmatprep.subr.bf16.mxu1 %v2658_v15  ;;  %v353_v34 = vpack.c.bf16 %v344_v32, %v343_v31  ;;  %v346_v38 = vld [vmem:[%s2978_s11 + $0x78] sm:$0xff]  ;;  %v350_v39 = vpack.c.bf16 %v338_v36, %v337_v35  ;;  %629 = vst.msk [vmem:[#allocation2 + $0xd8] sm:$0x1] %vm619_vm1, %v2776_v41  ;;  %630 = vst.msk [vmem:[#allocation2 + $0x11] sm:$0x1] %vm619_vm1, %v2776_v41 }
  0x28   : > { %v354_v40 = vpack.c.bf16 %v346_v38, %v345_v37  ;;  %631 = vst.msk [vmem:[#allocation2 + $0x29] sm:$0x1] %vm619_vm1, %v2776_v41  ;;  %632 = vst.msk [vmem:[#allocation2 + $0x41] sm:$0x1] %vm619_vm1, %v2776_v41 }
  0x29   : > { %633 = vst.msk [vmem:[#allocation2 + $0x59] sm:$0x1] %vm619_vm1, %v2776_v41  ;;  %634 = vst.msk [vmem:[#allocation2 + $0x71] sm:$0x1] %vm619_vm1, %v2776_v41 }
  0x2a   : > { %443 = vmatpush1.bf16.msra.mxu0 %v2660_v16  ;;  %2564 = vmatpush1.bf16.msra.mxu1 %v2660_v16  ;;  %635 = vst.msk [vmem:[#allocation2 + $0x89] sm:$0x1] %vm619_vm1, %v2776_v41  ;;  %636 = vst.msk [vmem:[#allocation2 + $0xa1] sm:$0x1] %vm619_vm1, %v2776_v41 }
  0x2b   : > { %637 = vst.msk [vmem:[#allocation2 + $0xb9] sm:$0x1] %vm619_vm1, %v2776_v41  ;;  %638 = vst.msk [vmem:[#allocation2 + $0xd1] sm:$0x1] %vm619_vm1, %v2776_v41 }
  0x2c   : > { %639 = vst.msk [vmem:[#allocation2 + $0xe9] sm:$0x1] %vm619_vm1, %v2776_v41 }
  0x2d   : > { %2318 = vmatmul.mubr.msk.bf16.vlgmr.msra.gmra.mxu0 %vm403_vm0, %v347_v21  ;;  %2322 = vmatmul.mubr.msk.bf16.vlgmr.msra.gmra.mxu1 %vm403_vm0, %v351_v22 }
  0x2e   : > { %470 = vmatprep.mubr.bf16.mxu0 %v2775_v13  ;;  %510 = vmatprep.mubr.bf16.mxu1 %v2775_v13 }
  0x35   : > { %2319 = vmatmul.mubr.msk.bf16.gmra.mxu0 %vm403_vm0, %v348_v27  ;;  %2323 = vmatmul.mubr.msk.bf16.gmra.mxu1 %vm403_vm0, %v352_v28 }
  0x36   : > { %480 = vmatprep.mubr.bf16.mxu0 %v2775_v13  ;;  %520 = vmatprep.mubr.bf16.mxu1 %v2775_v13 }
  0x3d   : > { %2320 = vmatmul.mubr.msk.bf16.gmra.mxu0 %vm403_vm0, %v349_v33  ;;  %2324 = vmatmul.mubr.msk.bf16.gmra.mxu1 %vm403_vm0, %v353_v34 }
  0x3e   : > { %490 = vmatprep.mubr.bf16.mxu0 %v2775_v13  ;;  %530 = vmatprep.mubr.bf16.mxu1 %v2775_v13 }
  0x45   : > { %2321 = vmatmul.mubr.msk.bf16.gmra.mxu0 %vm403_vm0, %v350_v39  ;;  %2325 = vmatmul.mubr.msk.bf16.gmra.mxu1 %vm403_vm0, %v354_v40 }
  0xed   : > { %v462_v43 = vpop.f32.mrf.mxu0  ;;  %v502_v44 = vpop.f32.mrf.mxu1 }
  0xee   : > { %v548_v46 = vadd.f32 %v3033_v42, %v462_v43  ;;  %v556_v47 = vadd.f32 %v3033_v42, %v502_v44 }
  0xef   : > { %v464_v48 = vpop.f32.mrf.mxu0  ;;  %v504_v49 = vpop.f32.mrf.mxu1 }
  0xf0   : > { %564 = vst [vmem:[#allocation4 + $0x30] sm:$0xff] %v548_v46  ;;  %572 = vst [vmem:[#allocation4 + $0x40] sm:$0xff] %v556_v47  ;;  %v587_v50 = vadd.f32 %v3038_v45, %v464_v48  ;;  %v595_v51 = vadd.f32 %v3038_v45, %v504_v49 }
  0xf1   : > { %v466_v52 = vpop.f32.mrf.mxu0  ;;  %v506_v53 = vpop.f32.mrf.mxu1 }
  0xf2   : > { %v603_v54 = vmax.f32 %v587_v50, 0.0  ;;  %v611_v55 = vmax.f32 %v595_v51, 0.0  ;;  %v549_v56 = vadd.f32 %v3033_v42, %v466_v52  ;;  %v557_v57 = vadd.f32 %v3033_v42, %v506_v53 }
  0xf3   : > { %v468_v58 = vpop.f32.mrf.mxu0  ;;  %v508_v59 = vpop.f32.mrf.mxu1 }
  0xf4   : > { %642 = vst.msk [vmem:[#allocation2 + $0x19] sm:$0xff] %vm641_vm2, %v603_v54  ;;  %650 = vst.msk [vmem:[#allocation2 + $0x79] sm:$0xff] %vm641_vm2, %v611_v55  ;;  %v588_v60 = vadd.f32 %v3038_v45, %v468_v58  ;;  %v596_v61 = vadd.f32 %v3038_v45, %v508_v59 }
  0xf5   : > { %565 = vst [vmem:[#allocation4] sm:$0xff] %v549_v56  ;;  %573 = vst [vmem:[#allocation4 + $0x20] sm:$0xff] %v557_v57  ;;  %v472_v62 = vpop.f32.mrf.mxu0  ;;  %v512_v63 = vpop.f32.mrf.mxu1 }
  0xf6   : > { %v604_v8 = vmax.f32 %v588_v60, 0.0  ;;  %v612_v9 = vmax.f32 %v596_v61, 0.0  ;;  %v550_v10 = vadd.f32 %v3033_v42, %v472_v62  ;;  %v558_v11 = vadd.f32 %v3033_v42, %v512_v63 }
  0xf7   : > { %v474_v12 = vpop.f32.mrf.mxu0  ;;  %v514_v13 = vpop.f32.mrf.mxu1 }
  0xf8   : > { %643 = vst.msk [vmem:[#allocation2 + $0x21] sm:$0xff] %vm641_vm2, %v604_v8  ;;  %651 = vst.msk [vmem:[#allocation2 + $0x81] sm:$0xff] %vm641_vm2, %v612_v9  ;;  %v589_v14 = vadd.f32 %v3038_v45, %v474_v12  ;;  %v597_v15 = vadd.f32 %v3038_v45, %v514_v13 }
  0xf9   : > { %566 = vst [vmem:[#allocation4 + $0x58] sm:$0xff] %v550_v10  ;;  %574 = vst [vmem:[#allocation4 + $0x10] sm:$0xff] %v558_v11  ;;  %v476_v16 = vpop.f32.mrf.mxu0  ;;  %v516_v17 = vpop.f32.mrf.mxu1 }
  0xfa   : > { %v605_v18 = vmax.f32 %v589_v14, 0.0  ;;  %v613_v19 = vmax.f32 %v597_v15, 0.0  ;;  %v551_v20 = vadd.f32 %v3033_v42, %v476_v16  ;;  %v559_v21 = vadd.f32 %v3033_v42, %v516_v17 }
  0xfb   : > { %v478_v22 = vpop.f32.mrf.mxu0  ;;  %v518_v23 = vpop.f32.mrf.mxu1 }
  0xfc   : > { %644 = vst.msk [vmem:[#allocation2 + $0x31] sm:$0xff] %vm641_vm2, %v605_v18  ;;  %652 = vst.msk [vmem:[#allocation2 + $0x91] sm:$0xff] %vm641_vm2, %v613_v19  ;;  %v590_v24 = vadd.f32 %v3038_v45, %v478_v22  ;;  %v598_v25 = vadd.f32 %v3038_v45, %v518_v23 }
  0xfd   : > { %567 = vst [vmem:[#allocation4 + $0x18] sm:$0xff] %v551_v20  ;;  %575 = vst [vmem:[#allocation4 + $0x38] sm:$0xff] %v559_v21  ;;  %v482_v26 = vpop.f32.mrf.mxu0  ;;  %v522_v27 = vpop.f32.mrf.mxu1 }
  0xfe   : > { %v606_v28 = vmax.f32 %v590_v24, 0.0  ;;  %v614_v29 = vmax.f32 %v598_v25, 0.0  ;;  %v552_v30 = vadd.f32 %v3033_v42, %v482_v26  ;;  %v560_v31 = vadd.f32 %v3033_v42, %v522_v27 }
  0xff   : > { %v484_v32 = vpop.f32.mrf.mxu0  ;;  %v524_v33 = vpop.f32.mrf.mxu1 }
 0x100   : > { %645 = vst.msk [vmem:[#allocation2 + $0x39] sm:$0xff] %vm641_vm2, %v606_v28  ;;  %653 = vst.msk [vmem:[#allocation2 + $0x99] sm:$0xff] %vm641_vm2, %v614_v29  ;;  %v591_v34 = vadd.f32 %v3038_v45, %v484_v32  ;;  %v599_v35 = vadd.f32 %v3038_v45, %v524_v33 }
 0x101   : > { %568 = vst [vmem:[#allocation4 + $0x50] sm:$0xff] %v552_v30  ;;  %576 = vst [vmem:[#allocation4 + $0x60] sm:$0xff] %v560_v31  ;;  %v486_v36 = vpop.f32.mrf.mxu0  ;;  %v526_v37 = vpop.f32.mrf.mxu1 }
 0x102   : > { %v607_v38 = vmax.f32 %v591_v34, 0.0  ;;  %v615_v39 = vmax.f32 %v599_v35, 0.0  ;;  %v553_v40 = vadd.f32 %v3033_v42, %v486_v36  ;;  %v561_v41 = vadd.f32 %v3033_v42, %v526_v37 }
 0x103   : > { %v488_v43 = vpop.f32.mrf.mxu0  ;;  %v528_v44 = vpop.f32.mrf.mxu1 }
 0x104   : > { %646 = vst.msk [vmem:[#allocation2 + $0x49] sm:$0xff] %vm641_vm2, %v607_v38  ;;  %654 = vst.msk [vmem:[#allocation2 + $0xa9] sm:$0xff] %vm641_vm2, %v615_v39  ;;  %v592_v46 = vadd.f32 %v3038_v45, %v488_v43  ;;  %v600_v47 = vadd.f32 %v3038_v45, %v528_v44 }
 0x105   : > { %569 = vst [vmem:[#allocation4 + $0x68] sm:$0xff] %v553_v40  ;;  %577 = vst [vmem:[#allocation4 + $0x70] sm:$0xff] %v561_v41  ;;  %v492_v48 = vpop.f32.mrf.mxu0  ;;  %v532_v49 = vpop.f32.mrf.mxu1 }
 0x106   : > { %v608_v50 = vmax.f32 %v592_v46, 0.0  ;;  %v616_v51 = vmax.f32 %v600_v47, 0.0  ;;  %v554_v52 = vadd.f32 %v3033_v42, %v492_v48  ;;  %v562_v53 = vadd.f32 %v3033_v42, %v532_v49 }
 0x107   : > { %v494_v54 = vpop.f32.mrf.mxu0  ;;  %v534_v55 = vpop.f32.mrf.mxu1 }
 0x108   : > { %647 = vst.msk [vmem:[#allocation2 + $0x51] sm:$0xff] %vm641_vm2, %v608_v50  ;;  %655 = vst.msk [vmem:[#allocation2 + $0xb1] sm:$0xff] %vm641_vm2, %v616_v51  ;;  %v593_v56 = vadd.f32 %v3038_v45, %v494_v54  ;;  %v601_v57 = vadd.f32 %v3038_v45, %v534_v55 }
 0x109   : > { %570 = vst [vmem:[#allocation4 + $0x8] sm:$0xff] %v554_v52  ;;  %578 = vst [vmem:[#allocation4 + $0x78] sm:$0xff] %v562_v53  ;;  %v496_v58 = vpop.f32.mrf.mxu0  ;;  %v536_v59 = vpop.f32.mrf.mxu1 }
 0x10a   : > { %v609_v60 = vmax.f32 %v593_v56, 0.0  ;;  %v617_v61 = vmax.f32 %v601_v57, 0.0  ;;  %v555_v62 = vadd.f32 %v3033_v42, %v496_v58  ;;  %v563_v63 = vadd.f32 %v3033_v42, %v536_v59 }
 0x10b   : > { %v498_v8 = vpop.f32.mrf.mxu0  ;;  %v538_v9 = vpop.f32.mrf.mxu1 }
 0x10c   : > { %648 = vst.msk [vmem:[#allocation2 + $0x61] sm:$0xff] %vm641_vm2, %v609_v60  ;;  %656 = vst.msk [vmem:[#allocation2 + $0xc1] sm:$0xff] %vm641_vm2, %v617_v61  ;;  %v594_v10 = vadd.f32 %v3038_v45, %v498_v8  ;;  %v602_v11 = vadd.f32 %v3038_v45, %v538_v9  ;;  %661 = sbr.rel (%p2328_p13) target bundleno = 275 (0x113), region = 56 }
 0x10d   : > { %571 = vst [vmem:[#allocation4 + $0x48] sm:$0xff] %v555_v62  ;;  %579 = vst [vmem:[#allocation4 + $0x28] sm:$0xff] %v563_v63 }
 0x10e   : > { %v610_v12 = vmax.f32 %v594_v10, 0.0  ;;  %v618_v13 = vmax.f32 %v602_v11, 0.0 }
 0x110   : > { %649 = vst.msk [vmem:[#allocation2 + $0x69] sm:$0xff] %vm641_vm2, %v610_v12  ;;  %657 = vst.msk [vmem:[#allocation2 + $0xc9] sm:$0xff] %vm641_vm2, %v618_v13 }
 0x111   : > { %v2777_v42 = vmov 0.0  }
 0x112   : > { %662 = vst.msk [vmem:[#allocation2 + $0x1] sm:$0xff] %vm641_vm2, %v2777_v42  ;;  %663 = vst.msk [vmem:[#allocation2 + $0x9] sm:$0xff] %vm641_vm2, %v2777_v42 }
 0x113 PF: > { %p2329_p0 = scmp.le.s32.totalorder %s2757_s30, 0 }
 0x114   : > { %s3815_s17 = sshll.u32 (!%p2329_p0), %s2757_s30, 3 }
 0x115   : > { %667 = sbr.rel (%p2329_p0) target bundleno = 501 (0x1f5), region = 60  ;;  %s2330_s21 = sadd.s32 (!%p2329_p0), 4294967295, %s3815_s17 }
 0x116   : > { %s2331_s25 = sshll.u32 (!%p2329_p0), %s2330_s21, 4 }
 0x117   : > { %s670_s22 = scalar_lea.vmem (!%p2329_p0), %s2972_s16, %s2331_s25 }
 0x11a   : > { %v2336_v45 = vcombine.low %v2944_v6, %v2949_v7  ;;  %v2778_v14 = vmov 0.0   ;;  %v2335_v15 = vcombine.low %v2934_v4, %v2939_v5  ;;  %vm2779_vm3 = vmmov 0   ;;  %v671_v18 = vld [vmem:[%s670_s22] sm:$0xff]  ;;  %v672_v19 = vld [vmem:[%s670_s22 + $0x8] sm:$0xff] }
 0x11b   : > { %2493 = vmatprep.subr.bf16.mxu0 %v2778_v14  ;;  %2501 = vmatprep.mubr.msk.bf16.mxu0 %vm2779_vm3, %v2778_v14  ;;  %v2334_v16 = vcombine.low %v2924_v2, %v2929_v3  ;;  %v2333_v17 = vcombine.low %v2910_v0, %v2915_v1  ;;  %v673_v20 = vpack.c.bf16 %v672_v19, %v671_v18  ;;  %v2332_v21 = vld [vmem:[%s3799_s2] ss:$0 sm:$0xff] }
 0x11c   : > { %2494 = vmatpush3.bf16.msra.mxu0 %v2336_v45 }
 0x11d   : > { %2495 = vmatprep.subr.bf16.mxu0 %v2778_v14 }
 0x120   : > { %2496 = vmatpush3.bf16.msra.mxu0 %v2335_v15 }
 0x121   : > { %2497 = vmatprep.subr.bf16.mxu0 %v2778_v14 }
 0x124   : > { %2498 = vmatpush3.bf16.msra.mxu0 %v2334_v16 }
 0x125   : > { %2499 = vmatprep.subr.bf16.mxu0 %v2778_v14 }
 0x128   : > { %2500 = vmatpush3.bf16.msra.mxu0 %v2333_v17 }
 0x12b   : > { %2502 = vmatmul.mubr.msk.bf16.vlgmr.msra.gmra.mxu0 %vm403_vm0, %v673_v20 }
 0x1eb   : > { %v742_v22 = vpop.f32.mrf.mxu0 }
 0x1ec   : > { %v743_v23 = vadd.f32 %v2332_v21, %v742_v22 }
 0x1ed   : > { %v2503_v24 = vpop.f32.mrf.mxu0 }
 0x1ee   : > { %v749_v25 = vmax.f32 %v743_v23, 0.0 }
 0x1ef   : > { %v745_v26 = vpop.f32.mrf.mxu0 }
 0x1f0   : > { %751 = vst.msk [vmem:[#allocation2 + $0x1] sm:$0xff] %vm641_vm2, %v749_v25  ;;  %v746_v27 = vadd.f32 %v2332_v21, %v745_v26 }
 0x1f1   : > { %v2504_v28 = vpop.f32.mrf.mxu0 }
 0x1f2   : > { %v750_v29 = vmax.f32 %v746_v27, 0.0 }
 0x1f4   : > { %752 = vst.msk [vmem:[#allocation2 + $0x9] sm:$0xff] %vm641_vm2, %v750_v29 }
 0x1f5 PF: > { %p2338_p1 = scmp.ne.s32.totalorder %s2757_s30, 1 }
 0x1f7   : > { %756 = sbr.rel (%p2338_p1) target bundleno = 510 (0x1fe), region = 64 }
 0x1fc   : > { %v2780_v30 = vmov 0.0  }
 0x1fd   : > { %758 = vst.msk [vmem:[#allocation2 + $0xd9] sm:$0xff] %vm641_vm2, %v2780_v30  ;;  %759 = vst.msk [vmem:[#allocation2 + $0xe1] sm:$0xff] %vm641_vm2, %v2780_v30 }
 0x1fe PF: > { %p2339_p2 = scmp.ge.s32.totalorder %s2757_s30, 1 }
 0x200   : > { %763 = sbr.rel (%p2339_p2) target bundleno = 736 (0x2e0), region = 68 }
 0x205   : > { %v2348_v31 = vcombine.low %v2944_v6, %v2949_v7  ;;  %v2781_v32 = vmov 0.0   ;;  %v2347_v33 = vcombine.low %v2934_v4, %v2939_v5  ;;  %vm2782_vm4 = vmmov 0   ;;  %v2342_v36 = vld [vmem:[%s2978_s11 + $0x80] sm:$0xff]  ;;  %v2343_v6 = vld [vmem:[%s2978_s11 + $0x88] sm:$0xff] }
 0x206   : > { %2505 = vmatprep.subr.bf16.mxu0 %v2781_v32  ;;  %2513 = vmatprep.mubr.msk.bf16.mxu0 %vm2782_vm4, %v2781_v32  ;;  %v2346_v34 = vcombine.low %v2924_v2, %v2929_v3  ;;  %v2345_v35 = vcombine.low %v2910_v0, %v2915_v1  ;;  %v769_v7 = vpack.c.bf16 %v2343_v6, %v2342_v36  ;;  %v2344_v4 = vld [vmem:[%s3799_s2] ss:$0 sm:$0xff] }
 0x207   : > { %2506 = vmatpush3.bf16.msra.mxu0 %v2348_v31 }
 0x208   : > { %2507 = vmatprep.subr.bf16.mxu0 %v2781_v32 }
 0x20b   : > { %2508 = vmatpush3.bf16.msra.mxu0 %v2347_v33 }
 0x20c   : > { %2509 = vmatprep.subr.bf16.mxu0 %v2781_v32 }
 0x20f   : > { %2510 = vmatpush3.bf16.msra.mxu0 %v2346_v34 }
 0x210   : > { %2511 = vmatprep.subr.bf16.mxu0 %v2781_v32 }
 0x213   : > { %2512 = vmatpush3.bf16.msra.mxu0 %v2345_v35 }
 0x216   : > { %2514 = vmatmul.mubr.msk.bf16.vlgmr.msra.gmra.mxu0 %vm403_vm0, %v769_v7 }
 0x2d6   : > { %v838_v5 = vpop.f32.mrf.mxu0 }
 0x2d7   : > { %v839_v37 = vadd.f32 %v2344_v4, %v838_v5 }
 0x2d8   : > { %v2515_v38 = vpop.f32.mrf.mxu0 }
 0x2d9   : > { %v845_v2 = vmax.f32 %v839_v37, 0.0 }
 0x2da   : > { %v841_v3 = vpop.f32.mrf.mxu0 }
 0x2db   : > { %848 = vst.msk [vmem:[#allocation2 + $0xd9] sm:$0xff] %vm641_vm2, %v845_v2  ;;  %v842_v39 = vadd.f32 %v2344_v4, %v841_v3 }
 0x2dc   : > { %v2516_v0 = vpop.f32.mrf.mxu0 }
 0x2dd   : > { %v846_v1 = vmax.f32 %v842_v39, 0.0 }
 0x2df   : > { %849 = vst.msk [vmem:[#allocation2 + $0xe1] sm:$0xff] %vm641_vm2, %v846_v1 }
 0x2e0 PF: > { %v3132_v40 = vld [vmem:[#allocation2 + $0x1a] sm:$0xff]  ;;  %s2783_s11 = smov 32   ;;  %v3137_v43 = vld [vmem:[#allocation2 + $0x30] sm:$0xff]  ;;  %v3141_v46 = vld [vmem:[#allocation2 + $0x22] sm:$0xff]  ;;  %s2784_s24 = smov 64   ;;  %vm962_vm5 = vcmask 523520  }
 0x2e1   : > { %v882_v41 = vld [vmem:[#allocation2 + $0x1] sm:$0xff]  ;;  %1237 = vrot.lane.b32.xlu0 %v3132_v40, %s2783_s11  ;;  %v3139_v44 = vld [vmem:[#allocation2 + $0x38] sm:$0xff]  ;;  %v883_v47 = vld [vmem:[#allocation2 + $0x9] sm:$0xff]  ;;  %870 = vst.msk [vmem:[#allocation3 + $0x60] sm:$0xff] %vm641_vm2, %v3137_v43  ;;  %s2785_s13 = smov 96   ;;  %vm1059_vm6 = vcmask 785920  }
 0x2e2   : > { %914 = vrot.lane.b32.xlu1 %v882_v41, %s2783_s11  ;;  %v3143_v48 = vld [vmem:[#allocation2 + $0x31] sm:$0xff]  ;;  %871 = vst.msk [vmem:[#allocation3 + $0x78] sm:$0xff] %vm641_vm2, %v3139_v44  ;;  %v3149_v49 = vld [vmem:[#allocation2 + $0x39] sm:$0xff]  ;;  %v3172_v55 = vld [vmem:[#allocation2 + $0x21] sm:$0xff]  ;;  %vm1156_vm7 = vcmask 1048320   ;;  %s2398_s17 = sshll.u32 %s2757_s30, 4 }
 0x2e3   : > { %v3151_v50 = vld [vmem:[#allocation2 + $0x18] sm:$0xff]  ;;  %v3153_v51 = vld [vmem:[#allocation2 + $0x20] sm:$0xff]  ;;  %1191 = vst.msk [vmem:[#allocation3 + $0x38] sm:$0xff] %vm641_vm2, %v3143_v48  ;;  %1192 = vst.msk [vmem:[#allocation3 + $0x50] sm:$0xff] %vm641_vm2, %v3149_v49  ;;  %s2391_s21 = sshll.u32 %s2761_s9, 5  ;;  %s2216_s9 = sshll.u32 %s3089_s20, 4  ;;  %s3740_s9 = int_to_ptr.vmem [resolvable:$true] %s2216_s9 }
 0x2e4   : > { %v3157_v52 = vld [vmem:[#allocation2 + $0x32] sm:$0xff]  ;;  %v3159_v53 = vld [vmem:[#allocation2 + $0x3a] sm:$0xff]  ;;  %868 = vst.msk [vmem:[#allocation3 + $0x30] sm:$0xff] %vm641_vm2, %v3151_v50  ;;  %869 = vst.msk [vmem:[#allocation3 + $0x48] sm:$0xff] %vm641_vm2, %v3153_v51  ;;  %s2213_s25 = sadd.s32 %s2398_s17, %s2391_s21  ;;  %s3816_s22 = sand.u32 1, %s2749_s28  }
 0x2e5   : > { %v3161_v54 = vld [vmem:[#allocation2 + $0x19] sm:$0xff]  ;;  %1239 = vrot.lane.b32.xlu0 %v3141_v46, %s2783_s11  ;;  %v3174_v56 = vld [vmem:[#allocation2 + $0x48] sm:$0xff]  ;;  %v3176_v57 = vld [vmem:[#allocation2 + $0x50] sm:$0xff]  ;;  %1510 = vst.msk [vmem:[#allocation3 + $0x10] sm:$0xff] %vm641_vm2, %v3157_v52  ;;  %s2392_s30 = sshll.u32 %s2213_s25, 7  ;;  %s3746_s26 = scalar_lea.sflag [#allocation6], %s3816_s22 }
 0x2e6   : > { %916 = vrot.lane.b32.xlu1 %v883_v47, %s2783_s11  ;;  %1189 = vst.msk [vmem:[#allocation3 + $0x8] sm:$0xff] %vm641_vm2, %v3161_v54  ;;  %1511 = vst.msk [vmem:[#allocation3 + $0x28] sm:$0xff] %vm641_vm2, %v3159_v53  ;;  %v3184_v58 = vld [vmem:[#allocation2 + $0x49] sm:$0xff]  ;;  %v3186_v59 = vld [vmem:[#allocation2 + $0x51] sm:$0xff]  ;;  %s2681_s15 = scalar_lea.vmem %s3740_s9, 2048  ;;  %s2786_s16 = smov [#allocation5]  }
 0x2e7   : > { %v3188_v60 = vld [vmem:[#allocation2 + $0x4a] sm:$0xff]  ;;  %1190 = vst.msk [vmem:[#allocation3 + $0x20] sm:$0xff] %vm641_vm2, %v3172_v55  ;;  %872 = vst.msk [vmem:[#allocation3 + $0x90] sm:$0xff] %vm641_vm2, %v3174_v56  ;;  %v3196_v61 = vld [vmem:[#allocation2 + $0x52] sm:$0xff]  ;;  %p2682_p4 = scmp.ne.s32.totalorder %s3740_s9, %s2681_s15  ;;  %s2685_s14 = sshll.u32 %s2786_s16, 4  ;;  %s2686_s14 = int_to_ptr.vmem [resolvable:$false] %s2685_s14 }
 0x2e8   : > { %873 = vst.msk [vmem:[#allocation3 + $0xa8] sm:$0xff] %vm641_vm2, %v3176_v57  ;;  %v3198_v62 = vld [vmem:[#allocation2 + $0x60] sm:$0xff]  ;;  %v3200_v63 = vld [vmem:[#allocation2 + $0x68] sm:$0xff]  ;;  %1512 = vst.msk [vmem:[#allocation3 + $0x40] sm:$0xff] %vm641_vm2, %v3188_v60  ;;  %s2687_s17 = scalar_lea.vmem %s2686_s14, 4096  ;;  %p2688_p7 = scmp.lt.s32.totalorder %s3740_s9, %s2686_s14 }
 0x2e9   : > { %1193 = vst.msk [vmem:[#allocation3 + $0x68] sm:$0xff] %vm641_vm2, %v3184_v58  ;;  %1194 = vst.msk [vmem:[#allocation3 + $0x80] sm:$0xff] %vm641_vm2, %v3186_v59  ;;  %v979_v8 = vld [vmem:[#allocation2 + $0x2] sm:$0xff]  ;;  %v980_v9 = vld [vmem:[#allocation2 + $0xa] sm:$0xff]  ;;  %1334 = vrot.lane.b32.xlu0 %v3137_v43, %s2784_s24  ;;  %p2683_p5 = pnand %p2682_p4, %p2885_p3  ;;  %p2689_p9 = scmp.lt.s32.totalorder %s2687_s17, %s2681_s15 }
 0x2ea   : > { %v3208_v10 = vld [vmem:[#allocation2 + $0x61] sm:$0xff]  ;;  %v3210_v11 = vld [vmem:[#allocation2 + $0x69] sm:$0xff]  ;;  %1513 = vst.msk [vmem:[#allocation3 + $0x58] sm:$0xff] %vm641_vm2, %v3196_v61  ;;  %874 = vst.msk [vmem:[#allocation3 + $0xc0] sm:$0xff] %vm641_vm2, %v3198_v62  ;;  %1336 = vrot.lane.b32.xlu1 %v3139_v44, %s2784_s24 }
 0x2eb   : > { %v3212_v12 = vld [vmem:[#allocation2 + $0x62] sm:$0xff]  ;;  %875 = vst.msk [vmem:[#allocation3 + $0xd8] sm:$0xff] %vm641_vm2, %v3200_v63  ;;  %v3224_v13 = vld [vmem:[#allocation2 + $0x6a] sm:$0xff]  ;;  %v3226_v42 = vld [vmem:[#allocation2 + $0x78] sm:$0xff]  ;;  %p2684_p6 = pneg %p2683_p5  ;;  %p2690_p10 = por %p2689_p9, %p2688_p7 }
 0x2ec   : > { %v3228_v45 = vld [vmem:[#allocation2 + $0x80] sm:$0xff]  ;;  %1195 = vst.msk [vmem:[#allocation3 + $0x98] sm:$0xff] %vm641_vm2, %v3208_v10  ;;  %1196 = vst.msk [vmem:[#allocation3 + $0xb0] sm:$0xff] %vm641_vm2, %v3210_v11  ;;  %v3250_v18 = vld [vmem:[#allocation2 + $0x90] sm:$0xff] }
 0x2ed   : > { %1514 = vst.msk [vmem:[#allocation3 + $0x70] sm:$0xff] %vm641_vm2, %v3212_v12  ;;  %v3236_v14 = vld [vmem:[#allocation2 + $0x79] sm:$0xff]  ;;  %v3238_v15 = vld [vmem:[#allocation2 + $0x81] sm:$0xff]  ;;  %1515 = vst.msk [vmem:[#allocation3 + $0x88] sm:$0xff] %vm641_vm2, %v3224_v13  ;;  %1011 = vrot.lane.b32.xlu0 %v979_v8, %s2784_s24  ;;  %p2691_p11 = pnand %p2690_p10, %p2684_p6 }
 0x2ee   : > { %v3240_v16 = vld [vmem:[#allocation2 + $0x7a] sm:$0xff]  ;;  %876 = vst.msk [vmem:[#allocation3 + $0xf0] sm:$0xff] %vm641_vm2, %v3226_v42  ;;  %877 = vst.msk [vmem:[#allocation3 + $0x108] sm:$0xff] %vm641_vm2, %v3228_v45  ;;  %v3248_v17 = vld [vmem:[#allocation2 + $0x82] sm:$0xff]  ;;  %1013 = vrot.lane.b32.xlu1 %v980_v9, %s2784_s24 }
 0x2ef   : > { %v3252_v19 = vld [vmem:[#allocation2 + $0x98] sm:$0xff]  ;;  %1516 = vst.msk [vmem:[#allocation3 + $0xa0] sm:$0xff] %vm641_vm2, %v3240_v16  ;;  %1197 = vst.msk [vmem:[#allocation3 + $0xc8] sm:$0xff] %vm641_vm2, %v3236_v14  ;;  %v850_v23 = vld [vmem:[#allocation2] sm:$0xff] }
 0x2f0   : > { %1198 = vst.msk [vmem:[#allocation3 + $0xe0] sm:$0xff] %vm641_vm2, %v3238_v15  ;;  %v3260_v20 = vld [vmem:[#allocation2 + $0x91] sm:$0xff]  ;;  %v3262_v21 = vld [vmem:[#allocation2 + $0x99] sm:$0xff]  ;;  %1517 = vst.msk [vmem:[#allocation3 + $0xb8] sm:$0xff] %vm641_vm2, %v3248_v17 }
 0x2f1   : > { %878 = vst.msk [vmem:[#allocation3 + $0x120] sm:$0xff] %vm641_vm2, %v3250_v18  ;;  %879 = vst.msk [vmem:[#allocation3 + $0x138] sm:$0xff] %vm641_vm2, %v3252_v19  ;;  %v2661_v22 = vld [vmem:[%s3801_s4 + $0x78] sm:$0xff]   ;;  %v2663_v25 = vld [vmem:[%s3801_s4 + $0x70] sm:$0xff]   ;;  %1430 = vrot.lane.b32.xlu0 %v3143_v48, %s2785_s13 }
 0x2f2   : > { %1199 = vst.msk [vmem:[#allocation3 + $0xf8] sm:$0xff] %vm641_vm2, %v3260_v20  ;;  %1200 = vst.msk [vmem:[#allocation3 + $0x110] sm:$0xff] %vm641_vm2, %v3262_v21  ;;  %v2662_v24 = vld [vmem:[%s3801_s4 + $0x38] sm:$0xff]   ;;  %2409 = vmatprep.subr.bf16.mxu0 %v2661_v22  ;;  %v2664_v26 = vld [vmem:[%s3801_s4 + $0x30] sm:$0xff]   ;;  %1432 = vrot.lane.b32.xlu1 %v3149_v49, %s2785_s13 }
 0x2f3   : > { %866 = vst.msk [vmem:[#allocation3] sm:$0xff] %vm641_vm2, %v850_v23  ;;  %2410 = vmatpush3.bf16.msra.mxu0 %v2662_v24  ;;  %v851_v27 = vld [vmem:[#allocation2 + $0x8] sm:$0xff]  ;;  %v3293_v28 = vld [vmem:[#allocation2 + $0x92] sm:$0xff]  ;;  %v3295_v29 = vld [vmem:[#allocation2 + $0x9a] sm:$0xff] }
 0x2f4   : > { %2411 = vmatprep.subr.bf16.mxu0 %v2663_v25  ;;  %867 = vst.msk [vmem:[#allocation3 + $0x18] sm:$0xff] %vm641_vm2, %v851_v27  ;;  %v2665_v30 = vld [vmem:[%s3801_s4 + $0x68] sm:$0xff]   ;;  %1518 = vst.msk [vmem:[#allocation3 + $0xd0] sm:$0xff] %vm641_vm2, %v3293_v28  ;;  %v2667_v33 = vld [vmem:[%s3801_s4 + $0x60] sm:$0xff]  }
 0x2f5   : > { %1519 = vst.msk [vmem:[#allocation3 + $0xe8] sm:$0xff] %vm641_vm2, %v3295_v29  ;;  %v2666_v31 = vld [vmem:[%s3801_s4 + $0x28] sm:$0xff]   ;;  %1108 = vrot.lane.b32.xlu0 %v3151_v50, %s2785_s13  ;;  %v3317_v34 = vld [vmem:[#allocation2 + $0xb0] sm:$0xff]  ;;  %v2668_v35 = vld [vmem:[%s3801_s4 + $0x20] sm:$0xff]  }
 0x2f6   : > { %1110 = vrot.lane.b32.xlu1 %v3153_v51, %s2785_s13  ;;  %v3312_v32 = vld [vmem:[#allocation2 + $0xa8] sm:$0xff]  ;;  %881 = vst.msk [vmem:[#allocation3 + $0x168] sm:$0xff] %vm641_vm2, %v3317_v34  ;;  %v2669_v6 = vld [vmem:[%s3801_s4 + $0x58] sm:$0xff]   ;;  %v2671_v37 = vld [vmem:[%s3801_s4 + $0x50] sm:$0xff]  }
 0x2f7   : > { %2412 = vmatpush3.bf16.msra.mxu0 %v2664_v26  ;;  %880 = vst.msk [vmem:[#allocation3 + $0x150] sm:$0xff] %vm641_vm2, %v3312_v32  ;;  %v3330_v36 = vld [vmem:[#allocation2 + $0xa9] sm:$0xff]  ;;  %v3337_v7 = vld [vmem:[#allocation2 + $0xb1] sm:$0xff]  ;;  %v1528_v39 = vld [vmem:[#allocation3 + $0x10] sm:$0xff] }
 0x2f8   : > { %2413 = vmatprep.subr.bf16.mxu0 %v2665_v30  ;;  %1201 = vst.msk [vmem:[#allocation3 + $0x128] sm:$0xff] %vm641_vm2, %v3330_v36  ;;  %v2670_v4 = vld [vmem:[%s3801_s4 + $0x18] sm:$0xff]   ;;  %1202 = vst.msk [vmem:[#allocation3 + $0x140] sm:$0xff] %vm641_vm2, %v3337_v7  ;;  %v3348_v5 = vld [vmem:[#allocation2 + $0xaa] sm:$0xff] }
 0x2f9   : > { %1241 = vrot.lane.b32.xlu0 %v3157_v52, %s2783_s11  ;;  %1520 = vst.msk [vmem:[#allocation3 + $0x100] sm:$0xff] %vm641_vm2, %v3348_v5  ;;  %v2676_v38 = vld [vmem:[%s3801_s4 + $0x88] sm:$0xff]   ;;  %v2672_v2 = vld [vmem:[%s3801_s4 + $0x10] sm:$0xff]   ;;  %v2678_v1 = vld [vmem:[%s3801_s4 + $0x80] sm:$0xff]  }
 0x2fa   : > { %1243 = vrot.lane.b32.xlu1 %v3159_v53, %s2783_s11  ;;  %v3361_v3 = vld [vmem:[#allocation2 + $0xb2] sm:$0xff]  ;;  %v2673_v0 = vld [vmem:[%s3801_s4 + $0x48] sm:$0xff]   ;;  %2517 = vmatprep.subr.bf16.mxu1 %v2676_v38  ;;  %v2675_v9 = vld [vmem:[%s3801_s4 + $0x40] sm:$0xff]  }
 0x2fb   : > { %2414 = vmatpush3.bf16.msra.mxu0 %v2666_v31  ;;  %1521 = vst.msk [vmem:[#allocation3 + $0x118] sm:$0xff] %vm641_vm2, %v3361_v3  ;;  %v1531_v41 = vld [vmem:[#allocation3 + $0x28] sm:$0xff]  ;;  %v2674_v47 = vld [vmem:[%s3801_s4 + $0x8] sm:$0xff]   ;;  %2518 = vmatpush3.bf16.msra.mxu1 %v2676_v38  ;;  %v1534_v51 = vld [vmem:[#allocation3 + $0x40] sm:$0xff] }
 0x2fc   : > { %2415 = vmatprep.subr.bf16.mxu0 %v2667_v33  ;;  %v1576_v50 = vpack.c.bf16 %v1531_v41, %v1528_v39  ;;  %2519 = vmatprep.subr.bf16.mxu1 %v2678_v1  ;;  %v3380_v8 = vld [vmem:[#allocation2 + $0xc9] sm:$0xff] }
 0x2fd   : > { %918 = vrot.lane.b32.xlu0 %v3161_v54, %s2783_s11  ;;  %v1537_v54 = vld [vmem:[#allocation3 + $0x58] sm:$0xff]  ;;  %1204 = vst.msk [vmem:[#allocation3 + $0x170] sm:$0xff] %vm641_vm2, %v3380_v8 }
 0x2fe   : > { %920 = vrot.lane.b32.xlu1 %v3172_v55, %s2783_s11  ;;  %v3378_v55 = vld [vmem:[#allocation2 + $0xc1] sm:$0xff]  ;;  %2521 = vmatprep.mubr.msk.bf16.mxu1 %vm641_vm2, %v1576_v50  ;;  %v1579_v22 = vpack.c.bf16 %v1537_v54, %v1534_v51  ;;  %v3399_v23 = vld [vmem:[#allocation2 + $0xca] sm:$0xff] }
 0x2ff   : > { %2416 = vmatpush3.bf16.msra.mxu0 %v2668_v35  ;;  %1203 = vst.msk [vmem:[#allocation3 + $0x158] sm:$0xff] %vm641_vm2, %v3378_v55  ;;  %2520 = vmatpush3.bf16.msra.mxu1 %v2678_v1  ;;  %1523 = vst.msk [vmem:[#allocation3 + $0x148] sm:$0xff] %vm641_vm2, %v3399_v23  ;;  %v1549_v24 = vld [vmem:[#allocation3 + $0xb8] sm:$0xff]  ;;  %v1508_v1 = vld [vmem:[#allocation2 + $0xda] sm:$0xff] }
 0x300   : > { %2417 = vmatprep.subr.bf16.mxu0 %v2669_v6  ;;  %v3542_v38 = vld [vmem:[#allocation2 + $0xc8] sm:$0xff]  ;;  %1524 = vst.msk [vmem:[#allocation3 + $0x160] sm:$0xff] %vm641_vm2, %v1508_v1 }
 0x301   : > { %1338 = vrot.lane.b32.xlu0 %v3174_v56, %s2784_s24 }
 0x302   : > { %1340 = vrot.lane.b32.xlu1 %v3176_v57, %s2784_s24  ;;  %2522 = vmatmul.mubr.msk.bf16.vlgmr.msra.gmra.mxu1 %vm641_vm2, %v1579_v22 }
 0x303   : > { %2418 = vmatpush3.bf16.msra.mxu0 %v2670_v4 }
 0x304   : > { %2419 = vmatprep.subr.bf16.mxu0 %v2671_v37 }
 0x305   : > { %1015 = vrot.lane.b32.xlu0 %v3132_v40, %s2784_s24  ;;  %v2677_v40 = vld [vmem:[%s3801_s4] sm:$0xff]  }
 0x306   : > { %1017 = vrot.lane.b32.xlu1 %v3141_v46, %s2784_s24  ;;  %v3397_v46 = vld [vmem:[#allocation2 + $0xc2] sm:$0xff]  ;;  %v1567_v51 = vld [vmem:[#allocation3 + $0x148] sm:$0xff] }
 0x307   : > { %2420 = vmatpush3.bf16.msra.mxu0 %v2672_v2  ;;  %1522 = vst.msk [vmem:[#allocation3 + $0x130] sm:$0xff] %vm641_vm2, %v3397_v46 }
 0x308   : > { %2421 = vmatprep.subr.bf16.mxu0 %v2673_v0 }
 0x309   : > { %1434 = vrot.lane.b32.xlu0 %v3184_v58, %s2785_s13 }
 0x30a   : > { %1436 = vrot.lane.b32.xlu1 %v3186_v59, %s2785_s13 }
 0x30b   : > { %2422 = vmatpush3.bf16.msra.mxu0 %v2674_v47 }
 0x30c   : > { %2423 = vmatprep.subr.bf16.mxu0 %v2675_v9 }
 0x30d   : > { %1112 = vrot.lane.b32.xlu0 %v3137_v43, %s2785_s13  ;;  %v1540_v43 = vld [vmem:[#allocation3 + $0x70] sm:$0xff] }
 0x30e   : > { %1114 = vrot.lane.b32.xlu1 %v3139_v44, %s2785_s13  ;;  %v1543_v44 = vld [vmem:[#allocation3 + $0x88] sm:$0xff]  ;;  %v1564_v50 = vld [vmem:[#allocation3 + $0x130] sm:$0xff] }
 0x30f   : > { %2424 = vmatpush3.bf16.msra.mxu0 %v2677_v40  ;;  %v1594_v40 = vpack.c.bf16 %v1567_v51, %v1564_v50 }
 0x311   : > { %1245 = vrot.lane.b32.xlu0 %v3188_v60, %s2783_s11 }
 0x312   : > { %1247 = vrot.lane.b32.xlu1 %v3196_v61, %s2783_s11 }
 0x315   : > { %922 = vrot.lane.b32.xlu0 %v3143_v48, %s2783_s11  ;;  %v1582_v48 = vpack.c.bf16 %v1543_v44, %v1540_v43 }
 0x316   : > { %924 = vrot.lane.b32.xlu1 %v3149_v49, %s2783_s11  ;;  %v1546_v49 = vld [vmem:[#allocation3 + $0xa0] sm:$0xff] }
 0x317   : > { %v1585_v25 = vpack.c.bf16 %v1549_v24, %v1546_v49  ;;  %2525 = vmatprep.mubr.msk.bf16.mxu1 %vm641_vm2, %v1582_v48 }
 0x319   : > { %1342 = vrot.lane.b32.xlu0 %v3198_v62, %s2784_s24  ;;  %2526 = vmatmul.mubr.msk.bf16.gmra.mxu1 %vm641_vm2, %v1585_v25 }
 0x31a   : > { %1344 = vrot.lane.b32.xlu1 %v3200_v63, %s2784_s24 }
 0x31d   : > { %1019 = vrot.lane.b32.xlu0 %v3157_v52, %s2784_s24  ;;  %v1552_v52 = vld [vmem:[#allocation3 + $0xd0] sm:$0xff] }
 0x31e   : > { %1021 = vrot.lane.b32.xlu1 %v3159_v53, %s2784_s24  ;;  %v1555_v53 = vld [vmem:[#allocation3 + $0xe8] sm:$0xff] }
 0x321   : > { %1438 = vrot.lane.b32.xlu0 %v3208_v10, %s2785_s13 }
 0x322   : > { %1440 = vrot.lane.b32.xlu1 %v3210_v11, %s2785_s13 }
 0x325   : > { %1116 = vrot.lane.b32.xlu0 %v3174_v56, %s2785_s13 }
 0x326   : > { %1118 = vrot.lane.b32.xlu1 %v3176_v57, %s2785_s13 }
 0x329   : > { %1249 = vrot.lane.b32.xlu0 %v3212_v12, %s2783_s11 }
 0x32a   : > { %1251 = vrot.lane.b32.xlu1 %v3224_v13, %s2783_s11 }
 0x32d   : > { %926 = vrot.lane.b32.xlu0 %v3184_v58, %s2783_s11  ;;  %v1588_v58 = vpack.c.bf16 %v1555_v53, %v1552_v52  ;;  %v1316_v52 = vld [vmem:[#allocation2 + $0xd8] sm:$0xff]  ;;  %v1317_v53 = vld [vmem:[#allocation2 + $0xe0] sm:$0xff] }
 0x32e   : > { %928 = vrot.lane.b32.xlu1 %v3186_v59, %s2783_s11  ;;  %v1558_v59 = vld [vmem:[#allocation3 + $0x100] sm:$0xff] }
 0x32f   : > { %2529 = vmatprep.mubr.msk.bf16.mxu1 %vm641_vm2, %v1588_v58 }
 0x331   : > { %1346 = vrot.lane.b32.xlu0 %v3226_v42, %s2784_s24 }
 0x332   : > { %1348 = vrot.lane.b32.xlu1 %v3228_v45, %s2784_s24 }
 0x335   : > { %1023 = vrot.lane.b32.xlu0 %v3188_v60, %s2784_s24  ;;  %v1561_v60 = vld [vmem:[#allocation3 + $0x118] sm:$0xff] }
 0x336   : > { %1025 = vrot.lane.b32.xlu1 %v3196_v61, %s2784_s24  ;;  %v1591_v61 = vpack.c.bf16 %v1561_v60, %v1558_v59 }
 0x338   : > { %2530 = vmatmul.mubr.msk.bf16.gmra.mxu1 %vm641_vm2, %v1591_v61 }
 0x339   : > { %1442 = vrot.lane.b32.xlu0 %v3236_v14, %s2785_s13  ;;  %2533 = vmatprep.mubr.msk.bf16.mxu1 %vm641_vm2, %v1594_v40 }
 0x33a   : > { %1444 = vrot.lane.b32.xlu1 %v3238_v15, %s2785_s13 }
 0x33d   : > { %1120 = vrot.lane.b32.xlu0 %v3198_v62, %s2785_s13 }
 0x33e   : > { %1122 = vrot.lane.b32.xlu1 %v3200_v63, %s2785_s13 }
 0x341   : > { %1253 = vrot.lane.b32.xlu0 %v3240_v16, %s2783_s11 }
 0x342   : > { %1255 = vrot.lane.b32.xlu1 %v3248_v17, %s2783_s11 }
 0x345   : > { %930 = vrot.lane.b32.xlu0 %v3208_v10, %s2783_s11 }
 0x346   : > { %932 = vrot.lane.b32.xlu1 %v3210_v11, %s2783_s11 }
 0x349   : > { %1350 = vrot.lane.b32.xlu0 %v3250_v18, %s2784_s24 }
 0x34a   : > { %1352 = vrot.lane.b32.xlu1 %v3252_v19, %s2784_s24 }
 0x34d   : > { %1027 = vrot.lane.b32.xlu0 %v3212_v12, %s2784_s24 }
 0x34e   : > { %1029 = vrot.lane.b32.xlu1 %v3224_v13, %s2784_s24 }
 0x351   : > { %1446 = vrot.lane.b32.xlu0 %v3260_v20, %s2785_s13 }
 0x352   : > { %1448 = vrot.lane.b32.xlu1 %v3262_v21, %s2785_s13 }
 0x353   : > { %v1238_v56 = vpop.permute.xlu0 %1237 }
 0x354   : > { %v915_v57 = vpop.permute.xlu1 %914  ;;  %1285 = vst.msk [vmem:[#allocation3 + $0x8] sm:$0xff] %vm962_vm5, %v1238_v56 }
 0x355   : > { %963 = vst.msk [vmem:[#allocation3] sm:$0xff] %vm962_vm5, %v915_v57  ;;  %1124 = vrot.lane.b32.xlu0 %v3226_v42, %s2785_s13 }
 0x356   : > { %1126 = vrot.lane.b32.xlu1 %v3228_v45, %s2785_s13 }
 0x357   : > { %v1240_v62 = vpop.permute.xlu0 %1239 }
 0x358   : > { %v917_v63 = vpop.permute.xlu1 %916  ;;  %1286 = vst.msk [vmem:[#allocation3 + $0x20] sm:$0xff] %vm962_vm5, %v1240_v62 }
 0x359   : > { %964 = vst.msk [vmem:[#allocation3 + $0x18] sm:$0xff] %vm962_vm5, %v917_v63  ;;  %1257 = vrot.lane.b32.xlu0 %v3293_v28, %s2783_s11 }
 0x35a   : > { %1259 = vrot.lane.b32.xlu1 %v3295_v29, %s2783_s11 }
 0x35b   : > { %v1335_v10 = vpop.permute.xlu0 %1334 }
 0x35c   : > { %v1337_v11 = vpop.permute.xlu1 %1336  ;;  %1382 = vst.msk [vmem:[#allocation3 + $0x8] sm:$0xff] %vm1059_vm6, %v1335_v10 }
 0x35d   : > { %1383 = vst.msk [vmem:[#allocation3 + $0x20] sm:$0xff] %vm1059_vm6, %v1337_v11  ;;  %934 = vrot.lane.b32.xlu0 %v3236_v14, %s2783_s11 }
 0x35e   : > { %936 = vrot.lane.b32.xlu1 %v3238_v15, %s2783_s11 }
 0x35f   : > { %v1012_v12 = vpop.permute.xlu0 %1011 }
 0x360   : > { %v1014_v13 = vpop.permute.xlu1 %1013  ;;  %1060 = vst.msk [vmem:[#allocation3] sm:$0xff] %vm1059_vm6, %v1012_v12 }
 0x361   : > { %1061 = vst.msk [vmem:[#allocation3 + $0x18] sm:$0xff] %vm1059_vm6, %v1014_v13  ;;  %1354 = vrot.lane.b32.xlu0 %v3312_v32, %s2784_s24 }
 0x362   : > { %1356 = vrot.lane.b32.xlu1 %v3317_v34, %s2784_s24 }
 0x363   : > { %v1431_v42 = vpop.permute.xlu0 %1430 }
 0x364   : > { %v1433_v45 = vpop.permute.xlu1 %1432  ;;  %1478 = vst.msk [vmem:[#allocation3 + $0x8] sm:$0xff] %vm1156_vm7, %v1431_v42 }
 0x365   : > { %1479 = vst.msk [vmem:[#allocation3 + $0x20] sm:$0xff] %vm1156_vm7, %v1433_v45  ;;  %1031 = vrot.lane.b32.xlu0 %v3240_v16, %s2784_s24 }
 0x366   : > { %1033 = vrot.lane.b32.xlu1 %v3248_v17, %s2784_s24 }
 0x367   : > { %v1109_v14 = vpop.permute.xlu0 %1108 }
 0x368   : > { %v1111_v15 = vpop.permute.xlu1 %1110  ;;  %1157 = vst.msk [vmem:[#allocation3] sm:$0xff] %vm1156_vm7, %v1109_v14 }
 0x369   : > { %1158 = vst.msk [vmem:[#allocation3 + $0x18] sm:$0xff] %vm1156_vm7, %v1111_v15  ;;  %1450 = vrot.lane.b32.xlu0 %v3330_v36, %s2785_s13 }
 0x36a   : > { %1452 = vrot.lane.b32.xlu1 %v3337_v7, %s2785_s13 }
 0x36b   : > { %v1242_v26 = vpop.permute.xlu0 %1241  ;;  %v1527_v30 = vld [vmem:[#allocation3 + $0x8] sm:$0xff] }
 0x36c   : > { %v1244_v27 = vpop.permute.xlu1 %1243  ;;  %v1530_v31 = vld [vmem:[#allocation3 + $0x20] sm:$0xff]  ;;  %1287 = vst.msk [vmem:[#allocation3 + $0x38] sm:$0xff] %vm962_vm5, %v1242_v26 }
 0x36d   : > { %1288 = vst.msk [vmem:[#allocation3 + $0x50] sm:$0xff] %vm962_vm5, %v1244_v27  ;;  %v1575_v16 = vpack.c.bf16 %v1530_v31, %v1527_v30  ;;  %1128 = vrot.lane.b32.xlu0 %v3250_v18, %s2785_s13 }
 0x36e   : > { %1130 = vrot.lane.b32.xlu1 %v3252_v19, %s2785_s13  ;;  %v3540_v19 = vld [vmem:[#allocation2 + $0xc0] sm:$0xff] }
 0x36f   : > { %1805 = vmatprep.mubr.bf16.mxu0 %v1575_v16  ;;  %v919_v17 = vpop.permute.xlu0 %918  ;;  %v1526_v35 = vld [vmem:[#allocation3] sm:$0xff] }
 0x370   : > { %v921_v33 = vpop.permute.xlu1 %920  ;;  %v1529_v6 = vld [vmem:[#allocation3 + $0x18] sm:$0xff]  ;;  %965 = vst.msk [vmem:[#allocation3 + $0x30] sm:$0xff] %vm962_vm5, %v919_v17 }
 0x371   : > { %966 = vst.msk [vmem:[#allocation3 + $0x48] sm:$0xff] %vm962_vm5, %v921_v33  ;;  %v1574_v4 = vpack.c.bf16 %v1529_v6, %v1526_v35  ;;  %1261 = vrot.lane.b32.xlu0 %v3348_v5, %s2783_s11 }
 0x372   : > { %1263 = vrot.lane.b32.xlu1 %v3361_v3, %s2783_s11 }
 0x373   : > { %1806 = vmatmul.mubr.bf16.vlgmr.msra.gmra.mxu0 %v1574_v4  ;;  %v1339_v18 = vpop.permute.xlu0 %1338 }
 0x374   : > { %v1341_v37 = vpop.permute.xlu1 %1340  ;;  %1384 = vst.msk [vmem:[#allocation3 + $0x38] sm:$0xff] %vm1059_vm6, %v1339_v18 }
 0x375   : > { %1385 = vst.msk [vmem:[#allocation3 + $0x50] sm:$0xff] %vm1059_vm6, %v1341_v37  ;;  %938 = vrot.lane.b32.xlu0 %v3260_v20, %s2783_s11 }
 0x376   : > { %940 = vrot.lane.b32.xlu1 %v3262_v21, %s2783_s11  ;;  %v1509_v21 = vld [vmem:[#allocation2 + $0xe2] sm:$0xff] }
 0x377   : > { %v1016_v2 = vpop.permute.xlu0 %1015  ;;  %1525 = vst.msk [vmem:[#allocation3 + $0x178] sm:$0xff] %vm641_vm2, %v1509_v21 }
 0x378   : > { %v1018_v39 = vpop.permute.xlu1 %1017  ;;  %1062 = vst.msk [vmem:[#allocation3 + $0x30] sm:$0xff] %vm1059_vm6, %v1016_v2 }
 0x379   : > { %1063 = vst.msk [vmem:[#allocation3 + $0x48] sm:$0xff] %vm1059_vm6, %v1018_v39  ;;  %1358 = vrot.lane.b32.xlu0 %v3540_v19, %s2784_s24 }
 0x37a   : > { %1360 = vrot.lane.b32.xlu1 %v3542_v38, %s2784_s24 }
 0x37b   : > { %v1435_v20 = vpop.permute.xlu0 %1434 }
 0x37c   : > { %v1437_v0 = vpop.permute.xlu1 %1436  ;;  %1480 = vst.msk [vmem:[#allocation3 + $0x38] sm:$0xff] %vm1156_vm7, %v1435_v20 }
 0x37d   : > { %1481 = vst.msk [vmem:[#allocation3 + $0x50] sm:$0xff] %vm1156_vm7, %v1437_v0  ;;  %1035 = vrot.lane.b32.xlu0 %v3293_v28, %s2784_s24 }
 0x37e   : > { %1037 = vrot.lane.b32.xlu1 %v3295_v29, %s2784_s24  ;;  %v1570_v29 = vld [vmem:[#allocation3 + $0x160] sm:$0xff]  ;;  %v1573_v44 = vld [vmem:[#allocation3 + $0x178] sm:$0xff] }
 0x37f   : > { %v1113_v41 = vpop.permute.xlu0 %1112 }
 0x380   : > { %v1115_v47 = vpop.permute.xlu1 %1114  ;;  %1159 = vst.msk [vmem:[#allocation3 + $0x30] sm:$0xff] %vm1156_vm7, %v1113_v41 }
 0x381   : > { %1160 = vst.msk [vmem:[#allocation3 + $0x48] sm:$0xff] %vm1156_vm7, %v1115_v47  ;;  %1454 = vrot.lane.b32.xlu0 %v3378_v55, %s2785_s13  ;;  %v1597_v55 = vpack.c.bf16 %v1573_v44, %v1570_v29 }
 0x382   : > { %1456 = vrot.lane.b32.xlu1 %v3380_v8, %s2785_s13 }
 0x383   : > { %v1246_v54 = vpop.permute.xlu0 %1245  ;;  %v1533_v28 = vld [vmem:[#allocation3 + $0x38] sm:$0xff]  ;;  %2534 = vmatmul.mubr.msk.bf16.gmra.mxu1 %vm641_vm2, %v1597_v55 }
 0x384   : > { %v1248_v9 = vpop.permute.xlu1 %1247  ;;  %v1536_v22 = vld [vmem:[#allocation3 + $0x50] sm:$0xff]  ;;  %1289 = vst.msk [vmem:[#allocation3 + $0x68] sm:$0xff] %vm962_vm5, %v1246_v54  ;;  %v2679_v55 = vld [vmem:[%s3803_s6 + $0x8] sm:$0xff]  }
 0x385   : > { %1290 = vst.msk [vmem:[#allocation3 + $0x80] sm:$0xff] %vm962_vm5, %v1248_v9  ;;  %v1578_v43 = vpack.c.bf16 %v1536_v22, %v1533_v28  ;;  %1132 = vrot.lane.b32.xlu0 %v3312_v32, %s2785_s13  ;;  %2537 = vmatprep.subr.bf16.mxu1 %v2679_v55 }
 0x386   : > { %1134 = vrot.lane.b32.xlu1 %v3317_v34, %s2785_s13  ;;  %2538 = vmatpush3.bf16.msra.mxu1 %v2679_v55 }
 0x387   : > { %1813 = vmatprep.mubr.bf16.mxu0 %v1578_v43  ;;  %v923_v8 = vpop.permute.xlu0 %922  ;;  %v1532_v49 = vld [vmem:[#allocation3 + $0x30] sm:$0xff] }
 0x388   : > { %v925_v48 = vpop.permute.xlu1 %924  ;;  %v1535_v24 = vld [vmem:[#allocation3 + $0x48] sm:$0xff]  ;;  %967 = vst.msk [vmem:[#allocation3 + $0x60] sm:$0xff] %vm962_vm5, %v923_v8 }
 0x389   : > { %968 = vst.msk [vmem:[#allocation3 + $0x78] sm:$0xff] %vm962_vm5, %v925_v48  ;;  %v1577_v25 = vpack.c.bf16 %v1535_v24, %v1532_v49  ;;  %1265 = vrot.lane.b32.xlu0 %v3397_v46, %s2783_s11  ;;  %v2680_v49 = vld [vmem:[%s3803_s6] sm:$0xff]  }
 0x38a   : > { %1267 = vrot.lane.b32.xlu1 %v3399_v23, %s2783_s11  ;;  %2539 = vmatprep.subr.bf16.mxu1 %v2680_v49 }
 0x38b   : > { %1814 = vmatmul.mubr.bf16.gmra.mxu0 %v1577_v25  ;;  %v1343_v32 = vpop.permute.xlu0 %1342  ;;  %2540 = vmatpush3.bf16.msra.mxu1 %v2680_v49 }
 0x38c   : > { %v1345_v34 = vpop.permute.xlu1 %1344  ;;  %1386 = vst.msk [vmem:[#allocation3 + $0x68] sm:$0xff] %vm1059_vm6, %v1343_v32 }
 0x38d   : > { %1387 = vst.msk [vmem:[#allocation3 + $0x80] sm:$0xff] %vm1059_vm6, %v1345_v34  ;;  %942 = vrot.lane.b32.xlu0 %v3330_v36, %s2783_s11  ;;  %v1412_v36 = vld [vmem:[#allocation2 + $0xd9] sm:$0xff] }
 0x38e   : > { %944 = vrot.lane.b32.xlu1 %v3337_v7, %s2783_s11  ;;  %v1413_v7 = vld [vmem:[#allocation2 + $0xe1] sm:$0xff] }
 0x38f   : > { %v1020_v56 = vpop.permute.xlu0 %1019 }
 0x390   : > { %v1022_v46 = vpop.permute.xlu1 %1021  ;;  %1064 = vst.msk [vmem:[#allocation3 + $0x60] sm:$0xff] %vm1059_vm6, %v1020_v56 }
 0x391   : > { %1065 = vst.msk [vmem:[#allocation3 + $0x78] sm:$0xff] %vm1059_vm6, %v1022_v46  ;;  %1362 = vrot.lane.b32.xlu0 %v1316_v52, %s2784_s24 }
 0x392   : > { %1364 = vrot.lane.b32.xlu1 %v1317_v53, %s2784_s24 }
 0x393   : > { %v1439_v23 = vpop.permute.xlu0 %1438 }
 0x394   : > { %v1441_v57 = vpop.permute.xlu1 %1440  ;;  %1482 = vst.msk [vmem:[#allocation3 + $0x68] sm:$0xff] %vm1156_vm7, %v1439_v23 }
 0x395   : > { %1483 = vst.msk [vmem:[#allocation3 + $0x80] sm:$0xff] %vm1156_vm7, %v1441_v57  ;;  %1039 = vrot.lane.b32.xlu0 %v3348_v5, %s2784_s24 }
 0x396   : > { %1041 = vrot.lane.b32.xlu1 %v3361_v3, %s2784_s24 }
 0x397   : > { %v1117_v58 = vpop.permute.xlu0 %1116 }
 0x398   : > { %v1119_v59 = vpop.permute.xlu1 %1118  ;;  %1161 = vst.msk [vmem:[#allocation3 + $0x60] sm:$0xff] %vm1156_vm7, %v1117_v58 }
 0x399   : > { %1162 = vst.msk [vmem:[#allocation3 + $0x78] sm:$0xff] %vm1156_vm7, %v1119_v59  ;;  %1458 = vrot.lane.b32.xlu0 %v1412_v36, %s2785_s13 }
 0x39a   : > { %1460 = vrot.lane.b32.xlu1 %v1413_v7, %s2785_s13 }
 0x39b   : > { %v1250_v60 = vpop.permute.xlu0 %1249  ;;  %v1539_v62 = vld [vmem:[#allocation3 + $0x68] sm:$0xff] }
 0x39c   : > { %v1252_v61 = vpop.permute.xlu1 %1251  ;;  %v1542_v63 = vld [vmem:[#allocation3 + $0x80] sm:$0xff]  ;;  %1291 = vst.msk [vmem:[#allocation3 + $0x98] sm:$0xff] %vm962_vm5, %v1250_v60 }
 0x39d   : > { %1292 = vst.msk [vmem:[#allocation3 + $0xb0] sm:$0xff] %vm962_vm5, %v1252_v61  ;;  %v1581_v5 = vpack.c.bf16 %v1542_v63, %v1539_v62  ;;  %1136 = vrot.lane.b32.xlu0 %v3540_v19, %s2785_s13 }
 0x39e   : > { %1138 = vrot.lane.b32.xlu1 %v3542_v38, %s2785_s13  ;;  %s3738_s13 = scalar_lea.hbm %s3805_s8, %s2392_s30 }
 0x39f   : > { %1821 = vmatprep.mubr.bf16.mxu0 %v1581_v5  ;;  %v927_v3 = vpop.permute.xlu0 %926  ;;  %v1538_v11 = vld [vmem:[#allocation3 + $0x60] sm:$0xff] }
 0x3a0   : > { %v929_v10 = vpop.permute.xlu1 %928  ;;  %v1541_v12 = vld [vmem:[#allocation3 + $0x78] sm:$0xff]  ;;  %969 = vst.msk [vmem:[#allocation3 + $0x90] sm:$0xff] %vm962_vm5, %v927_v3 }
 0x3a1   : > { %970 = vst.msk [vmem:[#allocation3 + $0xa8] sm:$0xff] %vm962_vm5, %v929_v10  ;;  %v1580_v13 = vpack.c.bf16 %v1541_v12, %v1538_v11 }
 0x3a3   : > { %1822 = vmatmul.mubr.bf16.gmra.mxu0 %v1580_v13  ;;  %v1347_v42 = vpop.permute.xlu0 %1346 }
 0x3a4   : > { %v1349_v45 = vpop.permute.xlu1 %1348  ;;  %1388 = vst.msk [vmem:[#allocation3 + $0x98] sm:$0xff] %vm1059_vm6, %v1347_v42 }
 0x3a5   : > { %1389 = vst.msk [vmem:[#allocation3 + $0xb0] sm:$0xff] %vm1059_vm6, %v1349_v45 }
 0x3a7   : > { %v1024_v14 = vpop.permute.xlu0 %1023 }
 0x3a8   : > { %v1026_v15 = vpop.permute.xlu1 %1025  ;;  %1066 = vst.msk [vmem:[#allocation3 + $0x90] sm:$0xff] %vm1059_vm6, %v1024_v14 }
 0x3a9   : > { %1067 = vst.msk [vmem:[#allocation3 + $0xa8] sm:$0xff] %vm1059_vm6, %v1026_v15 }
 0x3ab   : > { %v1443_v26 = vpop.permute.xlu0 %1442 }
 0x3ac   : > { %v1445_v27 = vpop.permute.xlu1 %1444  ;;  %1484 = vst.msk [vmem:[#allocation3 + $0x98] sm:$0xff] %vm1156_vm7, %v1443_v26 }
 0x3ad   : > { %1485 = vst.msk [vmem:[#allocation3 + $0xb0] sm:$0xff] %vm1156_vm7, %v1445_v27 }
 0x3af   : > { %v1121_v30 = vpop.permute.xlu0 %1120 }
 0x3b0   : > { %v1123_v31 = vpop.permute.xlu1 %1122  ;;  %1163 = vst.msk [vmem:[#allocation3 + $0x90] sm:$0xff] %vm1156_vm7, %v1121_v30 }
 0x3b1   : > { %1164 = vst.msk [vmem:[#allocation3 + $0xa8] sm:$0xff] %vm1156_vm7, %v1123_v31 }
 0x3b3   : > { %v1254_v16 = vpop.permute.xlu0 %1253  ;;  %v1545_v33 = vld [vmem:[#allocation3 + $0x98] sm:$0xff] }
 0x3b4   : > { %v1256_v17 = vpop.permute.xlu1 %1255  ;;  %v1548_v35 = vld [vmem:[#allocation3 + $0xb0] sm:$0xff]  ;;  %1293 = vst.msk [vmem:[#allocation3 + $0xc8] sm:$0xff] %vm962_vm5, %v1254_v16 }
 0x3b5   : > { %1294 = vst.msk [vmem:[#allocation3 + $0xe0] sm:$0xff] %vm962_vm5, %v1256_v17  ;;  %v1584_v6 = vpack.c.bf16 %v1548_v35, %v1545_v33 }
 0x3b7   : > { %1829 = vmatprep.mubr.bf16.mxu0 %v1584_v6  ;;  %v931_v4 = vpop.permute.xlu0 %930  ;;  %v1544_v37 = vld [vmem:[#allocation3 + $0x90] sm:$0xff] }
 0x3b8   : > { %v933_v18 = vpop.permute.xlu1 %932  ;;  %v1547_v19 = vld [vmem:[#allocation3 + $0xa8] sm:$0xff]  ;;  %971 = vst.msk [vmem:[#allocation3 + $0xc0] sm:$0xff] %vm962_vm5, %v931_v4 }
 0x3b9   : > { %972 = vst.msk [vmem:[#allocation3 + $0xd8] sm:$0xff] %vm962_vm5, %v933_v18  ;;  %v1583_v38 = vpack.c.bf16 %v1547_v19, %v1544_v37 }
 0x3bb   : > { %1830 = vmatmul.mubr.bf16.gmra.mxu0 %v1583_v38  ;;  %v1351_v2 = vpop.permute.xlu0 %1350 }
 0x3bc   : > { %v1353_v39 = vpop.permute.xlu1 %1352  ;;  %1390 = vst.msk [vmem:[#allocation3 + $0xc8] sm:$0xff] %vm1059_vm6, %v1351_v2 }
 0x3bd   : > { %1391 = vst.msk [vmem:[#allocation3 + $0xe0] sm:$0xff] %vm1059_vm6, %v1353_v39 }
 0x3bf   : > { %v1028_v20 = vpop.permute.xlu0 %1027 }
 0x3c0   : > { %v1030_v0 = vpop.permute.xlu1 %1029  ;;  %1068 = vst.msk [vmem:[#allocation3 + $0xc0] sm:$0xff] %vm1059_vm6, %v1028_v20 }
 0x3c1   : > { %1069 = vst.msk [vmem:[#allocation3 + $0xd8] sm:$0xff] %vm1059_vm6, %v1030_v0 }
 0x3c3   : > { %v1447_v1 = vpop.permute.xlu0 %1446 }
 0x3c4   : > { %v1449_v21 = vpop.permute.xlu1 %1448  ;;  %1486 = vst.msk [vmem:[#allocation3 + $0xc8] sm:$0xff] %vm1156_vm7, %v1447_v1 }
 0x3c5   : > { %1487 = vst.msk [vmem:[#allocation3 + $0xe0] sm:$0xff] %vm1156_vm7, %v1449_v21 }
 0x3c7   : > { %v1125_v41 = vpop.permute.xlu0 %1124 }
 0x3c8   : > { %v1127_v47 = vpop.permute.xlu1 %1126  ;;  %1165 = vst.msk [vmem:[#allocation3 + $0xc0] sm:$0xff] %vm1156_vm7, %v1125_v41  ;;  %v2523_v41 = vpop.f32.mrf.mxu1 }
 0x3c9   : > { %1166 = vst.msk [vmem:[#allocation3 + $0xd8] sm:$0xff] %vm1156_vm7, %v1127_v47 }
 0x3cb   : > { %v1258_v50 = vpop.permute.xlu0 %1257  ;;  %v1551_v54 = vld [vmem:[#allocation3 + $0xc8] sm:$0xff] }
 0x3cc   : > { %v1260_v51 = vpop.permute.xlu1 %1259  ;;  %v1554_v9 = vld [vmem:[#allocation3 + $0xe0] sm:$0xff]  ;;  %1295 = vst.msk [vmem:[#allocation3 + $0xf8] sm:$0xff] %vm962_vm5, %v1258_v50  ;;  %v1904_v50 = vpop.f32.mrf.mxu1 }
 0x3cd   : > { %1296 = vst.msk [vmem:[#allocation3 + $0x110] sm:$0xff] %vm962_vm5, %v1260_v51  ;;  %v1587_v28 = vpack.c.bf16 %v1554_v9, %v1551_v54  ;;  %v3671_v54 = vld [vmem:[%s3802_s5] ss:$0 sm:$0xff] }
 0x3cf   : > { %1837 = vmatprep.mubr.bf16.mxu0 %v1587_v28  ;;  %v935_v22 = vpop.permute.xlu0 %934  ;;  %v1550_v29 = vld [vmem:[#allocation3 + $0xc0] sm:$0xff] }
 0x3d0   : > { %v937_v40 = vpop.permute.xlu1 %936  ;;  %v1553_v43 = vld [vmem:[#allocation3 + $0xd8] sm:$0xff]  ;;  %973 = vst.msk [vmem:[#allocation3 + $0xf0] sm:$0xff] %vm962_vm5, %v935_v22  ;;  %v2524_v22 = vpop.f32.mrf.mxu1 }
 0x3d1   : > { %974 = vst.msk [vmem:[#allocation3 + $0x108] sm:$0xff] %vm962_vm5, %v937_v40  ;;  %v1586_v44 = vpack.c.bf16 %v1553_v43, %v1550_v29 }
 0x3d3   : > { %1838 = vmatmul.mubr.bf16.gmra.mxu0 %v1586_v44  ;;  %v1355_v8 = vpop.permute.xlu0 %1354  ;;  %v1907_v44 = vpop.f32.mrf.mxu1 }
 0x3d4   : > { %v1357_v48 = vpop.permute.xlu1 %1356  ;;  %1392 = vst.msk [vmem:[#allocation3 + $0xf8] sm:$0xff] %vm1059_vm6, %v1355_v8 }
 0x3d5   : > { %1393 = vst.msk [vmem:[#allocation3 + $0x110] sm:$0xff] %vm1059_vm6, %v1357_v48 }
 0x3d7   : > { %v1032_v24 = vpop.permute.xlu0 %1031 }
 0x3d8   : > { %v1034_v25 = vpop.permute.xlu1 %1033  ;;  %1070 = vst.msk [vmem:[#allocation3 + $0xf0] sm:$0xff] %vm1059_vm6, %v1032_v24 }
 0x3d9   : > { %1071 = vst.msk [vmem:[#allocation3 + $0x108] sm:$0xff] %vm1059_vm6, %v1034_v25 }
 0x3db   : > { %v1451_v32 = vpop.permute.xlu0 %1450 }
 0x3dc   : > { %v1453_v34 = vpop.permute.xlu1 %1452  ;;  %1488 = vst.msk [vmem:[#allocation3 + $0xf8] sm:$0xff] %vm1156_vm7, %v1451_v32 }
 0x3dd   : > { %1489 = vst.msk [vmem:[#allocation3 + $0x110] sm:$0xff] %vm1156_vm7, %v1453_v34 }
 0x3df   : > { %v1129_v52 = vpop.permute.xlu0 %1128 }
 0x3e0   : > { %v1131_v53 = vpop.permute.xlu1 %1130  ;;  %1167 = vst.msk [vmem:[#allocation3 + $0xf0] sm:$0xff] %vm1156_vm7, %v1129_v52 }
 0x3e1   : > { %1168 = vst.msk [vmem:[#allocation3 + $0x108] sm:$0xff] %vm1156_vm7, %v1131_v53 }
 0x3e3   : > { %v1262_v56 = vpop.permute.xlu0 %1261  ;;  %v1557_v23 = vld [vmem:[#allocation3 + $0xf8] sm:$0xff] }
 0x3e4   : > { %v1264_v46 = vpop.permute.xlu1 %1263  ;;  %v1560_v57 = vld [vmem:[#allocation3 + $0x110] sm:$0xff]  ;;  %1297 = vst.msk [vmem:[#allocation3 + $0x128] sm:$0xff] %vm962_vm5, %v1262_v56 }
 0x3e5   : > { %1298 = vst.msk [vmem:[#allocation3 + $0x140] sm:$0xff] %vm962_vm5, %v1264_v46  ;;  %v1590_v36 = vpack.c.bf16 %v1560_v57, %v1557_v23 }
 0x3e7   : > { %1845 = vmatprep.mubr.bf16.mxu0 %v1590_v36  ;;  %v939_v7 = vpop.permute.xlu0 %938  ;;  %v1556_v59 = vld [vmem:[#allocation3 + $0xf0] sm:$0xff] }
 0x3e8   : > { %v941_v58 = vpop.permute.xlu1 %940  ;;  %v1559_v60 = vld [vmem:[#allocation3 + $0x108] sm:$0xff]  ;;  %975 = vst.msk [vmem:[#allocation3 + $0x120] sm:$0xff] %vm962_vm5, %v939_v7 }
 0x3e9   : > { %976 = vst.msk [vmem:[#allocation3 + $0x138] sm:$0xff] %vm962_vm5, %v941_v58  ;;  %v1589_v61 = vpack.c.bf16 %v1559_v60, %v1556_v59 }
 0x3eb   : > { %1846 = vmatmul.mubr.bf16.gmra.mxu0 %v1589_v61  ;;  %v1359_v62 = vpop.permute.xlu0 %1358  ;;  %v2527_v61 = vpop.f32.mrf.mxu1 }
 0x3ec   : > { %v1361_v63 = vpop.permute.xlu1 %1360  ;;  %1394 = vst.msk [vmem:[#allocation3 + $0x128] sm:$0xff] %vm1059_vm6, %v1359_v62 }
 0x3ed   : > { %1395 = vst.msk [vmem:[#allocation3 + $0x140] sm:$0xff] %vm1059_vm6, %v1361_v63  ;;  %v1920_v63 = vpop.f32.mrf.mxu1 }
 0x3ef   : > { %v1036_v5 = vpop.permute.xlu0 %1035 }
 0x3f0   : > { %v1038_v3 = vpop.permute.xlu1 %1037  ;;  %1072 = vst.msk [vmem:[#allocation3 + $0x120] sm:$0xff] %vm1059_vm6, %v1036_v5 }
 0x3f1   : > { %1073 = vst.msk [vmem:[#allocation3 + $0x138] sm:$0xff] %vm1059_vm6, %v1038_v3 }
 0x3f3   : > { %v1455_v10 = vpop.permute.xlu0 %1454 }
 0x3f4   : > { %v1457_v11 = vpop.permute.xlu1 %1456  ;;  %1490 = vst.msk [vmem:[#allocation3 + $0x128] sm:$0xff] %vm1156_vm7, %v1455_v10 }
 0x3f5   : > { %1491 = vst.msk [vmem:[#allocation3 + $0x140] sm:$0xff] %vm1156_vm7, %v1457_v11  ;;  %v2528_v11 = vpop.f32.mrf.mxu1 }
 0x3f7   : > { %v1133_v12 = vpop.permute.xlu0 %1132 }
 0x3f8   : > { %v1135_v13 = vpop.permute.xlu1 %1134  ;;  %1169 = vst.msk [vmem:[#allocation3 + $0x120] sm:$0xff] %vm1156_vm7, %v1133_v12 }
 0x3f9   : > { %1170 = vst.msk [vmem:[#allocation3 + $0x138] sm:$0xff] %vm1156_vm7, %v1135_v13 }
 0x3fb   : > { %v1266_v42 = vpop.permute.xlu0 %1265  ;;  %v1563_v14 = vld [vmem:[#allocation3 + $0x128] sm:$0xff] }
 0x3fc   : > { %v1268_v45 = vpop.permute.xlu1 %1267  ;;  %v1566_v15 = vld [vmem:[#allocation3 + $0x140] sm:$0xff]  ;;  %1299 = vst.msk [vmem:[#allocation3 + $0x158] sm:$0xff] %vm962_vm5, %v1266_v42 }
 0x3fd   : > { %1300 = vst.msk [vmem:[#allocation3 + $0x170] sm:$0xff] %vm962_vm5, %v1268_v45  ;;  %v1593_v26 = vpack.c.bf16 %v1566_v15, %v1563_v14  ;;  %v1923_v45 = vpop.f32.mrf.mxu1 }
 0x3ff   : > { %1853 = vmatprep.mubr.bf16.mxu0 %v1593_v26  ;;  %v943_v27 = vpop.permute.xlu0 %942  ;;  %v1562_v31 = vld [vmem:[#allocation3 + $0x120] sm:$0xff] }
 0x400   : > { %v945_v30 = vpop.permute.xlu1 %944  ;;  %v1565_v16 = vld [vmem:[#allocation3 + $0x138] sm:$0xff]  ;;  %977 = vst.msk [vmem:[#allocation3 + $0x150] sm:$0xff] %vm962_vm5, %v943_v27 }
 0x401   : > { %978 = vst.msk [vmem:[#allocation3 + $0x168] sm:$0xff] %vm962_vm5, %v945_v30  ;;  %v1592_v17 = vpack.c.bf16 %v1565_v16, %v1562_v31 }
 0x403   : > { %1854 = vmatmul.mubr.bf16.gmra.mxu0 %v1592_v17  ;;  %v1363_v33 = vpop.permute.xlu0 %1362 }
 0x404   : > { %v1365_v35 = vpop.permute.xlu1 %1364  ;;  %1396 = vst.msk [vmem:[#allocation3 + $0x158] sm:$0xff] %vm1059_vm6, %v1363_v33 }
 0x405   : > { %1397 = vst.msk [vmem:[#allocation3 + $0x170] sm:$0xff] %vm1059_vm6, %v1365_v35 }
 0x407   : > { %v1040_v6 = vpop.permute.xlu0 %1039 }
 0x408   : > { %v1042_v4 = vpop.permute.xlu1 %1041  ;;  %1074 = vst.msk [vmem:[#allocation3 + $0x150] sm:$0xff] %vm1059_vm6, %v1040_v6 }
 0x409   : > { %1075 = vst.msk [vmem:[#allocation3 + $0x168] sm:$0xff] %vm1059_vm6, %v1042_v4 }
 0x40b   : > { %v1459_v18 = vpop.permute.xlu0 %1458 }
 0x40c   : > { %v1461_v37 = vpop.permute.xlu1 %1460  ;;  %1492 = vst.msk [vmem:[#allocation3 + $0x158] sm:$0xff] %vm1156_vm7, %v1459_v18 }
 0x40d   : > { %1493 = vst.msk [vmem:[#allocation3 + $0x170] sm:$0xff] %vm1156_vm7, %v1461_v37 }
 0x40f   : > { %v1137_v19 = vpop.permute.xlu0 %1136 }
 0x410   : > { %v1139_v38 = vpop.permute.xlu1 %1138  ;;  %1171 = vst.msk [vmem:[#allocation3 + $0x150] sm:$0xff] %vm1156_vm7, %v1137_v19 }
 0x411   : > { %1172 = vst.msk [vmem:[#allocation3 + $0x168] sm:$0xff] %vm1156_vm7, %v1139_v38 }
 0x413   : > { %v1569_v2 = vld [vmem:[#allocation3 + $0x158] sm:$0xff] }
 0x414   : > { %v1572_v39 = vld [vmem:[#allocation3 + $0x170] sm:$0xff] }
 0x415   : > { %v1596_v20 = vpack.c.bf16 %v1572_v39, %v1569_v2 }
 0x417   : > { %1861 = vmatprep.mubr.bf16.mxu0 %v1596_v20  ;;  %v1568_v0 = vld [vmem:[#allocation3 + $0x150] sm:$0xff] }
 0x418   : > { %v1571_v1 = vld [vmem:[#allocation3 + $0x168] sm:$0xff] }
 0x419   : > { %v1595_v21 = vpack.c.bf16 %v1571_v1, %v1568_v0  ;;  %v2531_v0 = vpop.f32.mrf.mxu1 }
 0x41b   : > { %1862 = vmatmul.mubr.bf16.gmra.mxu0 %v1595_v21  ;;  %v1936_v21 = vpop.f32.mrf.mxu1 }
 0x433   : > { %v2425_v47 = vpop.f32.mrf.mxu0 }
 0x435   : > { %v2426_v51 = vpop.f32.mrf.mxu0 }
 0x436   : > { %v2427_v9 = vadd.f32 %v2426_v51, %v2425_v47  ;;  %v2532_v51 = vpop.f32.mrf.mxu1 }
 0x437   : > { %v2428_v28 = vpop.f32.mrf.mxu0 }
 0x438   : > { %v1808_v40 = vadd.f32 %v2427_v9, %v3671_v54 }
 0x439   : > { %v2429_v29 = vpop.f32.mrf.mxu0 }
 0x43a   : > { %v2430_v43 = vadd.f32 %v2429_v29, %v2428_v28  ;;  %v1905_v55 = vadd.f32 %v1904_v50, %v1808_v40  ;;  %v1939_v40 = vpop.f32.mrf.mxu1 }
 0x43c   : > { %v1811_v8 = vadd.f32 %v2430_v43, %v3671_v54  ;;  %v1967_v49 = vmax.f32 %v1905_v55, 0.0 }
 0x43e   : > { %v1908_v48 = vadd.f32 %v1907_v44, %v1811_v8 }
 0x440   : > { %v1968_v24 = vmax.f32 %v1908_v48, 0.0 }
 0x442   : > { %v1983_v25 = vpack.c.bf16 %v1968_v24, %v1967_v49 }
 0x444   : > { %2541 = vmatprep.mubr.msk.bf16.mxu1 %vm641_vm2, %v1983_v25 }
 0x44b   : > { %v2431_v32 = vpop.f32.mrf.mxu0 }
 0x44d   : > { %v2432_v34 = vpop.f32.mrf.mxu0 }
 0x44e   : > { %v2433_v52 = vadd.f32 %v2432_v34, %v2431_v32 }
 0x44f   : > { %v2434_v53 = vpop.f32.mrf.mxu0 }
 0x450   : > { %v1816_v56 = vadd.f32 %v2433_v52, %v3671_v54 }
 0x451   : > { %v2435_v46 = vpop.f32.mrf.mxu0 }
 0x452   : > { %v2436_v23 = vadd.f32 %v2435_v46, %v2434_v53  ;;  %v1913_v57 = vadd.f32 %v2523_v41, %v1816_v56 }
 0x454   : > { %v1819_v36 = vadd.f32 %v2436_v23, %v3671_v54  ;;  %v1969_v58 = vmax.f32 %v1913_v57, 0.0 }
 0x456   : > { %v1916_v7 = vadd.f32 %v2524_v22, %v1819_v36 }
 0x458   : > { %v1970_v59 = vmax.f32 %v1916_v7, 0.0 }
 0x45a   : > { %v1984_v60 = vpack.c.bf16 %v1970_v59, %v1969_v58  ;;  %v2535_v58 = vpop.f32.mrf.mxu1 }
 0x45c   : > { %2542 = vmatmul.mubr.msk.bf16.vlgmr.msra.gmra.mxu1 %vm641_vm2, %v1984_v60  ;;  %v1952_v60 = vpop.f32.mrf.mxu1 }
 0x463   : > { %v2437_v62 = vpop.f32.mrf.mxu0 }
 0x465   : > { %v2438_v5 = vpop.f32.mrf.mxu0 }
 0x466   : > { %v2439_v3 = vadd.f32 %v2438_v5, %v2437_v62  ;;  %v2536_v5 = vpop.f32.mrf.mxu1 }
 0x467   : > { %v2440_v10 = vpop.f32.mrf.mxu0 }
 0x468   : > { %v1824_v12 = vadd.f32 %v2439_v3, %v3671_v54 }
 0x469   : > { %v2441_v13 = vpop.f32.mrf.mxu0 }
 0x46a   : > { %v2442_v42 = vadd.f32 %v2441_v13, %v2440_v10  ;;  %v1921_v14 = vadd.f32 %v1920_v63, %v1824_v12  ;;  %v1955_v12 = vpop.f32.mrf.mxu1 }
 0x46c   : > { %v1827_v15 = vadd.f32 %v2442_v42, %v3671_v54  ;;  %v1971_v27 = vmax.f32 %v1921_v14, 0.0 }
 0x46e   : > { %v1924_v26 = vadd.f32 %v1923_v45, %v1827_v15 }
 0x470   : > { %v1972_v30 = vmax.f32 %v1924_v26, 0.0 }
 0x472   : > { %v1985_v31 = vpack.c.bf16 %v1972_v30, %v1971_v27 }
 0x474   : > { %2545 = vmatprep.mubr.msk.bf16.mxu1 %vm641_vm2, %v1985_v31 }
 0x47b   : > { %v2443_v16 = vpop.f32.mrf.mxu0 }
 0x47d   : > { %v2444_v17 = vpop.f32.mrf.mxu0 }
 0x47e   : > { %v2445_v33 = vadd.f32 %v2444_v17, %v2443_v16 }
 0x47f   : > { %v2446_v35 = vpop.f32.mrf.mxu0 }
 0x480   : > { %v1832_v6 = vadd.f32 %v2445_v33, %v3671_v54 }
 0x481   : > { %v2447_v4 = vpop.f32.mrf.mxu0 }
 0x482   : > { %v2448_v18 = vadd.f32 %v2447_v4, %v2446_v35  ;;  %v1929_v37 = vadd.f32 %v2527_v61, %v1832_v6 }
 0x484   : > { %v1835_v19 = vadd.f32 %v2448_v18, %v3671_v54  ;;  %v1973_v2 = vmax.f32 %v1929_v37, 0.0 }
 0x486   : > { %v1932_v38 = vadd.f32 %v2528_v11, %v1835_v19 }
 0x488   : > { %v1974_v39 = vmax.f32 %v1932_v38, 0.0 }
 0x48a   : > { %v1986_v20 = vpack.c.bf16 %v1974_v39, %v1973_v2  ;;  %v3700_v2 = vld [vmem:[%s3804_s7] ss:$0 sm:$0xff] }
 0x48c   : > { %2546 = vmatmul.mubr.msk.bf16.gmra.mxu1 %vm641_vm2, %v1986_v20  ;;  %v2137_v20 = vld [vmem:[#allocation4 + $0x58] sm:$0xff] }
 0x493   : > { %v2449_v1 = vpop.f32.mrf.mxu0 }
 0x495   : > { %v2450_v41 = vpop.f32.mrf.mxu0 }
 0x496   : > { %v2451_v47 = vadd.f32 %v2450_v41, %v2449_v1 }
 0x497   : > { %v2452_v50 = vpop.f32.mrf.mxu0 }
 0x498   : > { %v1840_v9 = vadd.f32 %v2451_v47, %v3671_v54 }
 0x499   : > { %v2453_v28 = vpop.f32.mrf.mxu0 }
 0x49a   : > { %v2454_v22 = vadd.f32 %v2453_v28, %v2452_v50  ;;  %v1937_v29 = vadd.f32 %v1936_v21, %v1840_v9  ;;  %v2135_v21 = vld [vmem:[#allocation4 + $0x30] sm:$0xff]  ;;  %v2138_v50 = vld [vmem:[#allocation4 + $0x18] sm:$0xff] }
 0x49c   : > { %v1843_v43 = vadd.f32 %v2454_v22, %v3671_v54  ;;  %v1975_v55 = vmax.f32 %v1937_v29, 0.0 }
 0x49e   : > { %v1940_v44 = vadd.f32 %v1939_v40, %v1843_v43  ;;  %v2136_v40 = vld [vmem:[#allocation4] sm:$0xff] }
 0x4a0   : > { %v1976_v8 = vmax.f32 %v1940_v44, 0.0 }
 0x4a2   : > { %v1987_v48 = vpack.c.bf16 %v1976_v8, %v1975_v55 }
 0x4a4   : > { %2549 = vmatprep.mubr.msk.bf16.mxu1 %vm641_vm2, %v1987_v48 }
 0x4ab   : > { %v2455_v49 = vpop.f32.mrf.mxu0 }
 0x4ad   : > { %v2456_v24 = vpop.f32.mrf.mxu0 }
 0x4ae   : > { %v2457_v25 = vadd.f32 %v2456_v24, %v2455_v49  ;;  %v2141_v24 = vld [vmem:[#allocation4 + $0x8] sm:$0xff] }
 0x4af   : > { %v2458_v32 = vpop.f32.mrf.mxu0 }
 0x4b0   : > { %v1848_v34 = vadd.f32 %v2457_v25, %v3671_v54 }
 0x4b1   : > { %v2459_v52 = vpop.f32.mrf.mxu0 }
 0x4b2   : > { %v2460_v53 = vadd.f32 %v2459_v52, %v2458_v32  ;;  %v1945_v56 = vadd.f32 %v2531_v0, %v1848_v34  ;;  %v2139_v34 = vld [vmem:[#allocation4 + $0x50] sm:$0xff] }
 0x4b4   : > { %v1851_v46 = vadd.f32 %v2460_v53, %v3671_v54  ;;  %v1977_v57 = vmax.f32 %v1945_v56, 0.0 }
 0x4b6   : > { %v1948_v23 = vadd.f32 %v2532_v51, %v1851_v46  ;;  %v2142_v46 = vld [vmem:[#allocation4 + $0x48] sm:$0xff] }
 0x4b8   : > { %v1978_v36 = vmax.f32 %v1948_v23, 0.0 }
 0x4ba   : > { %v1988_v7 = vpack.c.bf16 %v1978_v36, %v1977_v57 }
 0x4bc   : > { %2550 = vmatmul.mubr.msk.bf16.gmra.mxu1 %vm641_vm2, %v1988_v7 }
 0x4c3   : > { %v2461_v59 = vpop.f32.mrf.mxu0 }
 0x4c5   : > { %v2462_v61 = vpop.f32.mrf.mxu0 }
 0x4c6   : > { %v2463_v62 = vadd.f32 %v2462_v61, %v2461_v59 }
 0x4c7   : > { %v2464_v63 = vpop.f32.mrf.mxu0 }
 0x4c8   : > { %v1856_v3 = vadd.f32 %v2463_v62, %v3671_v54 }
 0x4c9   : > { %v2465_v10 = vpop.f32.mrf.mxu0 }
 0x4ca   : > { %v2466_v11 = vadd.f32 %v2465_v10, %v2464_v63  ;;  %v1953_v13 = vadd.f32 %v1952_v60, %v1856_v3  ;;  %v2145_v10 = vld [vmem:[#allocation4 + $0x10] sm:$0xff] }
 0x4cc   : > { %v1859_v42 = vadd.f32 %v2466_v11, %v3671_v54  ;;  %v1979_v14 = vmax.f32 %v1953_v13, 0.0  ;;  %v2143_v13 = vld [vmem:[#allocation4 + $0x40] sm:$0xff] }
 0x4ce   : > { %v1956_v45 = vadd.f32 %v1955_v12, %v1859_v42 }
 0x4d0   : > { %v1980_v15 = vmax.f32 %v1956_v45, 0.0 }
 0x4d2   : > { %v1989_v26 = vpack.c.bf16 %v1980_v15, %v1979_v14  ;;  %v2146_v15 = vld [vmem:[#allocation4 + $0x38] sm:$0xff] }
 0x4d4   : > { %2553 = vmatprep.mubr.msk.bf16.mxu1 %vm641_vm2, %v1989_v26 }
 0x4db   : > { %v2467_v27 = vpop.f32.mrf.mxu0 }
 0x4dd   : > { %v2468_v30 = vpop.f32.mrf.mxu0 }
 0x4de   : > { %v2469_v31 = vadd.f32 %v2468_v30, %v2467_v27 }
 0x4df   : > { %v2470_v16 = vpop.f32.mrf.mxu0 }
 0x4e0   : > { %v1864_v17 = vadd.f32 %v2469_v31, %v3671_v54 }
 0x4e1   : > { %v2471_v33 = vpop.f32.mrf.mxu0 }
 0x4e2   : > { %v2472_v35 = vadd.f32 %v2471_v33, %v2470_v16  ;;  %v1961_v6 = vadd.f32 %v2535_v58, %v1864_v17  ;;  %v2140_v58 = vld [vmem:[#allocation4 + $0x68] sm:$0xff]  ;;  %v2144_v16 = vld [vmem:[#allocation4 + $0x20] sm:$0xff] }
 0x4e4   : > { %v1867_v4 = vadd.f32 %v2472_v35, %v3671_v54  ;;  %v1981_v37 = vmax.f32 %v1961_v6, 0.0 }
 0x4e6   : > { %v1964_v18 = vadd.f32 %v2536_v5, %v1867_v4 }
 0x4e8   : > { %v1982_v19 = vmax.f32 %v1964_v18, 0.0 }
 0x4ea   : > { %v1990_v38 = vpack.c.bf16 %v1982_v19, %v1981_v37  ;;  %v2149_v19 = vld [vmem:[#allocation4 + $0x78] sm:$0xff] }
 0x4ec   : > { %2554 = vmatmul.mubr.msk.bf16.gmra.mxu1 %vm641_vm2, %v1990_v38 }
 0x51c   : > { %v2543_v39 = vpop.f32.mrf.mxu1 }
 0x51d   : > { %v2081_v0 = vadd.f32 %v2543_v39, %v3700_v2 }
 0x51e   : > { %v2072_v1 = vpop.f32.mrf.mxu1 }
 0x51f   : > { %v2153_v54 = vadd.f32 %v2137_v20, %v2081_v0  ;;  %v2073_v41 = vadd.f32 %v3700_v2, %v2072_v1  ;;  %v2147_v20 = vld [vmem:[#allocation4 + $0x60] sm:$0xff] }
 0x520   : > { %v2544_v47 = vpop.f32.mrf.mxu1 }
 0x521   : > { %v2169_v51 = vmax.f32 %v2153_v54, 0.0  ;;  %v2151_v9 = vadd.f32 %v2135_v21, %v2073_v41  ;;  %v2084_v28 = vadd.f32 %v2544_v47, %v3700_v2  ;;  %v2150_v54 = vld [vmem:[#allocation4 + $0x28] sm:$0xff] }
 0x522   : > { %v2075_v22 = vpop.f32.mrf.mxu1 }
 0x523   : > { %2185 = vst [vmem:[%s3089_s20 + $0x10] sm:$0xff] %v2169_v51  ;;  %v2167_v29 = vmax.f32 %v2151_v9, 0.0  ;;  %v2154_v43 = vadd.f32 %v2138_v50, %v2084_v28  ;;  %v2076_v44 = vadd.f32 %v3700_v2, %v2075_v22  ;;  %v2148_v9 = vld [vmem:[#allocation4 + $0x70] sm:$0xff] }
 0x525   : > { %2183 = vst [vmem:[%s3089_s20] sm:$0xff] %v2167_v29  ;;  %v2170_v55 = vmax.f32 %v2154_v43, 0.0  ;;  %v2152_v8 = vadd.f32 %v2136_v40, %v2076_v44 }
 0x527   : > { %2186 = vst [vmem:[%s3089_s20 + $0x18] sm:$0xff] %v2170_v55  ;;  %v2168_v48 = vmax.f32 %v2152_v8, 0.0 }
 0x529   : > { %2184 = vst [vmem:[%s3089_s20 + $0x8] sm:$0xff] %v2168_v48 }
 0x54c   : > { %v2547_v49 = vpop.f32.mrf.mxu1 }
 0x54d   : > { %v2097_v25 = vadd.f32 %v2547_v49, %v3700_v2 }
 0x54e   : > { %v2088_v32 = vpop.f32.mrf.mxu1 }
 0x54f   : > { %v2157_v52 = vadd.f32 %v2141_v24, %v2097_v25  ;;  %v2089_v53 = vadd.f32 %v3700_v2, %v2088_v32 }
 0x550   : > { %v2548_v56 = vpop.f32.mrf.mxu1 }
 0x551   : > { %v2173_v23 = vmax.f32 %v2157_v52, 0.0  ;;  %v2155_v57 = vadd.f32 %v2139_v34, %v2089_v53  ;;  %v2100_v36 = vadd.f32 %v2548_v56, %v3700_v2 }
 0x552   : > { %v2091_v7 = vpop.f32.mrf.mxu1 }
 0x553   : > { %2189 = vst [vmem:[%s3089_s20 + $0x30] sm:$0xff] %v2173_v23  ;;  %v2171_v59 = vmax.f32 %v2155_v57, 0.0  ;;  %v2158_v60 = vadd.f32 %v2142_v46, %v2100_v36  ;;  %v2092_v61 = vadd.f32 %v3700_v2, %v2091_v7 }
 0x555   : > { %2187 = vst [vmem:[%s3089_s20 + $0x20] sm:$0xff] %v2171_v59  ;;  %v2174_v62 = vmax.f32 %v2158_v60, 0.0  ;;  %v2156_v63 = vadd.f32 %v2140_v58, %v2092_v61 }
 0x557   : > { %2190 = vst [vmem:[%s3089_s20 + $0x38] sm:$0xff] %v2174_v62  ;;  %v2172_v5 = vmax.f32 %v2156_v63, 0.0 }
 0x559   : > { %2188 = vst [vmem:[%s3089_s20 + $0x28] sm:$0xff] %v2172_v5 }
 0x57c   : > { %v2551_v3 = vpop.f32.mrf.mxu1 }
 0x57d   : > { %v2113_v11 = vadd.f32 %v2551_v3, %v3700_v2 }
 0x57e   : > { %v2104_v12 = vpop.f32.mrf.mxu1 }
 0x57f   : > { %v2161_v42 = vadd.f32 %v2145_v10, %v2113_v11  ;;  %v2105_v45 = vadd.f32 %v3700_v2, %v2104_v12 }
 0x580   : > { %v2552_v14 = vpop.f32.mrf.mxu1 }
 0x581   : > { %v2177_v26 = vmax.f32 %v2161_v42, 0.0  ;;  %v2159_v27 = vadd.f32 %v2143_v13, %v2105_v45  ;;  %v2116_v30 = vadd.f32 %v2552_v14, %v3700_v2 }
 0x582   : > { %v2107_v31 = vpop.f32.mrf.mxu1 }
 0x583   : > { %2193 = vst [vmem:[%s3089_s20 + $0x50] sm:$0xff] %v2177_v26  ;;  %v2175_v17 = vmax.f32 %v2159_v27, 0.0  ;;  %v2162_v33 = vadd.f32 %v2146_v15, %v2116_v30  ;;  %v2108_v35 = vadd.f32 %v3700_v2, %v2107_v31 }
 0x585   : > { %2191 = vst [vmem:[%s3089_s20 + $0x40] sm:$0xff] %v2175_v17  ;;  %v2178_v6 = vmax.f32 %v2162_v33, 0.0  ;;  %v2160_v4 = vadd.f32 %v2144_v16, %v2108_v35 }
 0x587   : > { %2194 = vst [vmem:[%s3089_s20 + $0x58] sm:$0xff] %v2178_v6  ;;  %v2176_v18 = vmax.f32 %v2160_v4, 0.0 }
 0x589   : > { %2192 = vst [vmem:[%s3089_s20 + $0x48] sm:$0xff] %v2176_v18 }
 0x5ac   : > { %v2555_v37 = vpop.f32.mrf.mxu1 }
 0x5ad   : > { %v2129_v38 = vadd.f32 %v2555_v37, %v3700_v2 }
 0x5ae   : > { %v2120_v39 = vpop.f32.mrf.mxu1 }
 0x5af   : > { %v2165_v0 = vadd.f32 %v2149_v19, %v2129_v38  ;;  %v2121_v1 = vadd.f32 %v3700_v2, %v2120_v39 }
 0x5b0   : > { %v2556_v21 = vpop.f32.mrf.mxu1 }
 0x5b1   : > { %v2181_v41 = vmax.f32 %v2165_v0, 0.0  ;;  %v2163_v47 = vadd.f32 %v2147_v20, %v2121_v1  ;;  %v2132_v50 = vadd.f32 %v2556_v21, %v3700_v2 }
 0x5b2   : > { %v2123_v51 = vpop.f32.mrf.mxu1 }
 0x5b3   : > { %2197 = vst [vmem:[%s3089_s20 + $0x70] sm:$0xff] %v2181_v41  ;;  %v2179_v28 = vmax.f32 %v2163_v47, 0.0  ;;  %v2166_v22 = vadd.f32 %v2150_v54, %v2132_v50  ;;  %v2124_v40 = vadd.f32 %v3700_v2, %v2123_v51 }
 0x5b5   : > { %2195 = vst [vmem:[%s3089_s20 + $0x60] sm:$0xff] %v2179_v28  ;;  %v2182_v29 = vmax.f32 %v2166_v22, 0.0  ;;  %v2164_v43 = vadd.f32 %v2148_v9, %v2124_v40 }
 0x5b7   : > { %2198 = vst [vmem:[%s3089_s20 + $0x78] sm:$0xff] %v2182_v29  ;;  %v2180_v44 = vmax.f32 %v2164_v43, 0.0 }
 0x5b9   : > { %2196 = vst [vmem:[%s3089_s20 + $0x68] sm:$0xff] %v2180_v44 }
 0x5ba   : > { %2694 = shalt.err (!%p2691_p11)
}
 0x5bb   : > { %s2695_s20 = scalar_lea.hbm %s3738_s13, 2048  ;;  %s2699_s30 = scalar_lea.hbm %s3805_s8, 8192 }
 0x5bc   : > { %p2696_p12 = scmp.ne.s32.totalorder %s3738_s13, %s2695_s20  ;;  %p2700_p1 = scmp.lt.s32.totalorder %s3738_s13, %s3805_s8 }
 0x5bd   : > { %p2701_p2 = scmp.lt.s32.totalorder %s2699_s30, %s2695_s20 }
 0x5be   : > { %p2697_p13 = pnand %p2696_p12, %p2885_p3 }
 0x5bf   : > { %p2702_p4 = por %p2701_p2, %p2700_p1 }
 0x5c0   : > { %p2698_p0 = pneg %p2697_p13 }
 0x5c2   : > { %p2703_p5 = pnand %p2702_p4, %p2698_p0 }
 0x5c4   : > { %2706 = shalt.err (!%p2703_p5)
}
 0x5c5   : > { %s2787_s22 = smov 128   ;;  %s2788_s15 = smov 8  }
 0x5c6   : > { %2565 = dma.vmem_to_hbm [thread:$0]  (%p2885_p3), %s3740_s9, 2048, %s3738_s13, %s3746_s26, %s2787_s22, %s2787_s22, %s2788_s15  }
 0x5c7 PF: > { %p2571_p6 = scmp.ge.s32.totalorder %s2773_s12, 2  ;;  %s2231_s16 = sand.u32 1, %s2745_s27  }
 0x5c8   : > { %s2232_s14 = scalar_lea.sflag [#allocation6], %s2231_s16 }
 0x5c9   : > { %p2568_p7 = pnand %p2571_p6, %p2894_p8 }
 0x5cb   : > { %p2569_p9 = pneg %p2568_p7 }
 0x5cd   : > { %2740 = dma.done.wait (%p2569_p9), %s2232_s14, 2048  }
 0x5ce   : > { %2742 = vsyncadd (%p2569_p9), %s2232_s14, 4294965248  ;;  %s21_s12 = sadd.s32 1, %s2773_s12   ;;  %s3817_s9 = sld [smem:[#allocation8_spill]] }
 0x5cf   : > { %p18_p10 = scmp.ge.s32.totalorder %s21_s12, 6   ;;  %s3818_s18 = sld [smem:[#allocation9_spill]] }
 0x5d0   : > { %s3819_s11 = sld [smem:[#allocation10_spill]]  ;;  %s3820_s27 = smov %s2749_s28 }
 0x5d1   : > { %s3821_s28 = smov %s2753_s29  ;;  %s3822_s29 = smov %s2903_s23 }
 0x5d2   : > { %s3823_s30 = smov %s2765_s10  ;;  %20 = sbr.rel (!%p18_p10) target bundleno = 5 (0x5), region = 110 }
 0x5d5   : > { %s3824_s10 = smov %s3818_s18 }
 0x5d7   :  { %2237 = vsyncpa [#allocation6], 1 }
 0x5d8   :  { %2239 = vsyncpa [#allocation6 + $0x1], 1 }

</bundles_post_ra>
